<compile_context>
chip_gen: v7x
topology: tpu7x:2x2x1
jax: 0.10.0
libtpu: 0.0.40
codegen_flags: <defaults>
</compile_context>

<pallas_src>
import jax
import jax.numpy as jnp
from jax.experimental import pallas as pl
from jax.experimental.pallas import tpu as pltpu

# MLP layer sizes (MNIST flattened input).
LAYER_SIZES = [784, 128, 128, 64, 64, 32, 10]
LANE = 128
PADDED_OUT = 128                      # lane-dense output; real columns = 10

K_DIMS = [784, 128, 128, 64, 64, 32]  # per-layer input dims (all multiples of 16)
N_DIMS = [128, 128, 64, 64, 32, 10]   # per-layer output dims (real)
K_OFFS = [0, 784, 912, 1040, 1104, 1168]
TOTAL_K = 1200                        # sum of K_DIMS (multiple of 16)

# N used inside the kernel (last layer computed at full 128 width so the store
# is unmasked; padded columns are exactly zero because W6/b6 padding is zero).
KERNEL_N = [128, 128, 64, 64, 32, PADDED_OUT]


def _round_up(x, m):
    return (x + m - 1) // m * m


def _mlp_kernel(x_ref, w_ref, b_ref, o_ref):
    """Fused MLP: 5x (Linear + ReLU) followed by a final Linear.

    Matmuls run in bf16 on the MXU with f32 accumulation; the f32->bf16 input
    cast, bias add and ReLU are f32/VPU work.
    """
    h = x_ref[...].astype(jnp.bfloat16)          # (tile, 784) f32 -> bf16 in-kernel
    biases = b_ref[...]                          # (8, 128) f32, one vreg

    def layer(h_bf16, li, relu):
        koff, k, n = K_OFFS[li], K_DIMS[li], KERNEL_N[li]
        w = w_ref[koff:koff + k, 0:n]            # static, 16-aligned slab slice
        y = jnp.dot(h_bf16, w, preferred_element_type=jnp.float32)
        y = y + biases[li:li + 1, 0:n]           # (1, n) f32 broadcast
        if relu:
            y = jnp.maximum(y, 0.0)
        return y.astype(jnp.bfloat16)            # feed next MXU matmul in bf16

    for li in range(5):
        h = layer(h, li, relu=True)
    o_ref[...] = layer(h, 5, relu=False)         # bf16 store, cols 10..127 == 0


def pack_params(params):
    """One-time packing of the 6 (W, b) pairs into two resident slabs.

    Returns:
      w_slab: (TOTAL_K, 128) bfloat16 -- layer i lives at rows
              K_OFFS[i]:K_OFFS[i]+K_DIMS[i], cols 0:N_DIMS[i]; zeros elsewhere.
      b_slab: (8, 128) float32 -- row i holds bias of layer i in cols 0:N_DIMS[i].
    """
    assert len(params) == len(K_DIMS)
    w_slab = jnp.zeros((TOTAL_K, LANE), jnp.float32)
    b_slab = jnp.zeros((8, LANE), jnp.float32)
    for i, (w, b) in enumerate(params):
        w = jnp.asarray(w, jnp.float32)
        b = jnp.asarray(b, jnp.float32).reshape(-1)
        assert w.shape == (K_DIMS[i], N_DIMS[i])
        w_slab = w_slab.at[K_OFFS[i]:K_OFFS[i] + K_DIMS[i], :N_DIMS[i]].set(w)
        b_slab = b_slab.at[i, :N_DIMS[i]].set(b)
    return w_slab.astype(jnp.bfloat16), b_slab


def dnn_forward(x, w_slab, b_slab, *, batch_tile=512):
    """Runs the fused MLP Pallas kernel.

    x: (B, 784) float32 (un-padded, un-cast -- the kernel handles it)
    w_slab, b_slab: from pack_params()
    Returns: (B, 10) float32 logits.
    """
    B, F = x.shape
    assert F == LAYER_SIZES[0]

    # Cap the tile at ceil(B/2) (rounded to 16) so the grid has >= 2 parallel
    # steps whenever B allows it (uses both TensorCores on v7x).
    bt = min(batch_tile, max(16, _round_up(-(-B // 2), 16)))
    assert bt % 16 == 0, "batch_tile must be a multiple of 16 (bf16 sublane tile)"

    Bp = _round_up(B, bt)
    if Bp != B:
        x = jnp.pad(x, ((0, Bp - B), (0, 0)))    # batch-only pad, feature dim untouched

    # --- BlockSpecs -----------------------------------------------------------
    # x block: last dim equals the full array dim (784), so no 128-divisibility
    # requirement; batch tiled.
    x_spec = pl.BlockSpec((bt, F), lambda i: (i, 0))
    w_spec = pl.BlockSpec(w_slab.shape, lambda i: (0, 0))    # resident
    b_spec = pl.BlockSpec(b_slab.shape, lambda i: (0, 0))    # resident
    out_spec = pl.BlockSpec((bt, PADDED_OUT), lambda i: (i, 0))

    # --- cost estimate --------------------------------------------------------
    flops = 2 * Bp * sum(k * n for k, n in zip(K_DIMS, KERNEL_N))
    bytes_accessed = (Bp * F * 4
                      + w_slab.size * w_slab.dtype.itemsize
                      + b_slab.size * b_slab.dtype.itemsize
                      + Bp * PADDED_OUT * 2)
    cost = pl.CostEstimate(flops=flops, transcendentals=0,
                           bytes_accessed=bytes_accessed)

    # --- VMEM limit: actual working set with 2x margin, <= 32 MiB -------------
    vmem_need = (2 * bt * F * 4                               # x double-buffer (f32)
                 + 2 * bt * PADDED_OUT * 2                    # out double-buffer (bf16)
                 + 2 * (w_slab.size * 2 + b_slab.size * 4)    # resident slabs
                 + 8 * bt * LANE * 4)                         # activations / scratch
    vmem_limit = int(min(32 * 1024 * 1024, max(12 * 1024 * 1024, 2 * vmem_need)))

    out_padded = pl.pallas_call(
        _mlp_kernel,
        out_shape=jax.ShapeDtypeStruct((Bp, PADDED_OUT), jnp.bfloat16),
        grid_spec=pltpu.PrefetchScalarGridSpec(
            num_scalar_prefetch=0,
            grid=(Bp // bt,),
            in_specs=[x_spec, w_spec, b_spec],
            out_specs=out_spec,
        ),
        compiler_params=pltpu.CompilerParams(
            dimension_semantics=("parallel",),
            vmem_limit_bytes=vmem_limit,
        ),
        cost_estimate=cost,
    )(x, w_slab, b_slab)

    # Slice off batch padding and output lane padding; return f32 logits.
    return out_padded[:B, :LAYER_SIZES[-1]].astype(jnp.float32)


def init_params(key):
    """Deterministic PyTorch-Linear-style init: U(-1/sqrt(fan_in), 1/sqrt(fan_in))."""
    params = []
    for in_dim, out_dim in zip(LAYER_SIZES[:-1], LAYER_SIZES[1:]):
        key, kw, kb = jax.random.split(key, 3)
        bound = 1.0 / jnp.sqrt(jnp.float32(in_dim))
        w = jax.random.uniform(kw, (in_dim, out_dim), jnp.float32, -bound, bound)
        b = jax.random.uniform(kb, (1, out_dim), jnp.float32, -bound, bound)
        params.append((w, b))
    return params


def dnn_forward_ref(x, params):
    """Plain-JAX reference mirroring the kernel's numerics: per-layer bf16
    activation/weight casts, f32 accumulation/bias/ReLU, bf16 output rounding."""
    h = jnp.asarray(x, jnp.float32)
    for i, (w, b) in enumerate(params):
        hb = h.astype(jnp.bfloat16).astype(jnp.float32)
        wb = jnp.asarray(w, jnp.float32).astype(jnp.bfloat16).astype(jnp.float32)
        h = hb @ wb + jnp.asarray(b, jnp.float32).reshape(1, -1)
        if i < len(params) - 1:
            h = jnp.maximum(h, 0.0)
    return h.astype(jnp.bfloat16).astype(jnp.float32)   # kernel emits bf16 logits


if __name__ == "__main__":
    key = jax.random.PRNGKey(0)
    key, kx = jax.random.split(key)

    # Small batch; tile capping gives a 2-step parallel grid (both v7x TCs).
    batch = 256
    x = jax.random.normal(kx, (batch, LAYER_SIZES[0]), jnp.float32)
    params = init_params(key)
    w_slab, b_slab = pack_params(params)

    out = dnn_forward(x, w_slab, b_slab)
    out = jax.block_until_ready(out)

    ref = dnn_forward_ref(x, params)
    assert out.shape == (batch, 10), out.shape
    max_diff = float(jnp.max(jnp.abs(out - ref)))
    assert jnp.allclose(out, ref, atol=2e-2, rtol=2e-2), f"max abs diff {max_diff}"

    print("KERNEL_OK")
</pallas_src>

<mosaic_0001>
module attributes {stable_mosaic.version = 11 : i64} {
  func.func @_mlp_kernel(%arg0: i32, %arg1: memref<128x784xf32, #tpu.memory_space<vmem>>, %arg2: memref<1200x128xbf16, #tpu.memory_space<vmem>>, %arg3: memref<8x128xf32, #tpu.memory_space<vmem>>, %arg4: memref<128x128xbf16, #tpu.memory_space<vmem>>) attributes {dimension_semantics = [#tpu.dimension_semantics<parallel>], iteration_bounds = array<i64: 2>, scalar_prefetch = 0 : i64, scratch_operands = 0 : i64, tpu.core_type = #tpu.core_type<tc>, window_params = [{transform_indices = @transform_0, window_bounds = array<i64: 128, 784>}, {pipeline_mode = #tpu.pipeline_mode<synchronous>, transform_indices = @transform_1, window_bounds = array<i64: 1200, 128>}, {pipeline_mode = #tpu.pipeline_mode<synchronous>, transform_indices = @transform_2, window_bounds = array<i64: 8, 128>}, {transform_indices = @transform_3, window_bounds = array<i64: 128, 128>}]} {
    %c0 = arith.constant 0 : index
    %c0_0 = arith.constant 0 : index
    %0 = vector.load %arg1[%c0, %c0_0] : memref<128x784xf32, #tpu.memory_space<vmem>>, vector<128x784xf32>
    %1 = arith.truncf %0 : vector<128x784xf32> to vector<128x784xbf16>
    %c0_1 = arith.constant 0 : index
    %c0_2 = arith.constant 0 : index
    %2 = vector.load %arg3[%c0_1, %c0_2] : memref<8x128xf32, #tpu.memory_space<vmem>>, vector<8x128xf32>
    %c0_3 = arith.constant 0 : index
    %c0_4 = arith.constant 0 : index
    %3 = vector.load %arg2[%c0_3, %c0_4] : memref<1200x128xbf16, #tpu.memory_space<vmem>>, vector<784x128xbf16>
    %cst = arith.constant dense<0.000000e+00> : vector<128x128xf32>
    %4 = tpu.matmul %1, %3, %cst {dimension_numbers = #tpu.dot_dimension_numbers<[1], [0], [0], [1], [0, 0, 1, 1], [], []>} : vector<128x784xbf16>, vector<784x128xbf16>, vector<128x128xf32> -> vector<128x128xf32>
    %5 = vector.extract_strided_slice %2 {offsets = [0, 0], sizes = [1, 128], strides = [1, 1]} : vector<8x128xf32> to vector<1x128xf32>
    %6 = vector.broadcast %5 : vector<1x128xf32> to vector<128x128xf32>
    %7 = arith.addf %4, %6 : vector<128x128xf32>
    %cst_5 = arith.constant 0.000000e+00 : f32
    %8 = vector.broadcast %cst_5 : f32 to vector<128x128xf32>
    %9 = arith.maximumf %7, %8 : vector<128x128xf32>
    %10 = arith.truncf %9 : vector<128x128xf32> to vector<128x128xbf16>
    %c784 = arith.constant 784 : index
    %c0_6 = arith.constant 0 : index
    %11 = vector.load %arg2[%c784, %c0_6] : memref<1200x128xbf16, #tpu.memory_space<vmem>>, vector<128x128xbf16>
    %cst_7 = arith.constant dense<0.000000e+00> : vector<128x128xf32>
    %12 = tpu.matmul %10, %11, %cst_7 {dimension_numbers = #tpu.dot_dimension_numbers<[1], [0], [0], [1], [0, 0, 1, 1], [], []>} : vector<128x128xbf16>, vector<128x128xbf16>, vector<128x128xf32> -> vector<128x128xf32>
    %13 = vector.extract_strided_slice %2 {offsets = [1, 0], sizes = [1, 128], strides = [1, 1]} : vector<8x128xf32> to vector<1x128xf32>
    %14 = vector.broadcast %13 : vector<1x128xf32> to vector<128x128xf32>
    %15 = arith.addf %12, %14 : vector<128x128xf32>
    %cst_8 = arith.constant 0.000000e+00 : f32
    %16 = vector.broadcast %cst_8 : f32 to vector<128x128xf32>
    %17 = arith.maximumf %15, %16 : vector<128x128xf32>
    %18 = arith.truncf %17 : vector<128x128xf32> to vector<128x128xbf16>
    %c912 = arith.constant 912 : index
    %c0_9 = arith.constant 0 : index
    %19 = vector.load %arg2[%c912, %c0_9] : memref<1200x128xbf16, #tpu.memory_space<vmem>>, vector<128x64xbf16>
    %cst_10 = arith.constant dense<0.000000e+00> : vector<128x64xf32>
    %20 = tpu.matmul %18, %19, %cst_10 {dimension_numbers = #tpu.dot_dimension_numbers<[1], [0], [0], [1], [0, 0, 1, 1], [], []>} : vector<128x128xbf16>, vector<128x64xbf16>, vector<128x64xf32> -> vector<128x64xf32>
    %21 = vector.extract_strided_slice %2 {offsets = [2, 0], sizes = [1, 64], strides = [1, 1]} : vector<8x128xf32> to vector<1x64xf32>
    %22 = vector.broadcast %21 : vector<1x64xf32> to vector<128x64xf32>
    %23 = arith.addf %20, %22 : vector<128x64xf32>
    %cst_11 = arith.constant 0.000000e+00 : f32
    %24 = vector.broadcast %cst_11 : f32 to vector<128x64xf32>
    %25 = arith.maximumf %23, %24 : vector<128x64xf32>
    %26 = arith.truncf %25 : vector<128x64xf32> to vector<128x64xbf16>
    %c1040 = arith.constant 1040 : index
    %c0_12 = arith.constant 0 : index
    %27 = vector.load %arg2[%c1040, %c0_12] : memref<1200x128xbf16, #tpu.memory_space<vmem>>, vector<64x64xbf16>
    %cst_13 = arith.constant dense<0.000000e+00> : vector<128x64xf32>
    %28 = tpu.matmul %26, %27, %cst_13 {dimension_numbers = #tpu.dot_dimension_numbers<[1], [0], [0], [1], [0, 0, 1, 1], [], []>} : vector<128x64xbf16>, vector<64x64xbf16>, vector<128x64xf32> -> vector<128x64xf32>
    %29 = vector.extract_strided_slice %2 {offsets = [3, 0], sizes = [1, 64], strides = [1, 1]} : vector<8x128xf32> to vector<1x64xf32>
    %30 = vector.broadcast %29 : vector<1x64xf32> to vector<128x64xf32>
    %31 = arith.addf %28, %30 : vector<128x64xf32>
    %cst_14 = arith.constant 0.000000e+00 : f32
    %32 = vector.broadcast %cst_14 : f32 to vector<128x64xf32>
    %33 = arith.maximumf %31, %32 : vector<128x64xf32>
    %34 = arith.truncf %33 : vector<128x64xf32> to vector<128x64xbf16>
    %c1104 = arith.constant 1104 : index
    %c0_15 = arith.constant 0 : index
    %35 = vector.load %arg2[%c1104, %c0_15] : memref<1200x128xbf16, #tpu.memory_space<vmem>>, vector<64x32xbf16>
    %cst_16 = arith.constant dense<0.000000e+00> : vector<128x32xf32>
    %36 = tpu.matmul %34, %35, %cst_16 {dimension_numbers = #tpu.dot_dimension_numbers<[1], [0], [0], [1], [0, 0, 1, 1], [], []>} : vector<128x64xbf16>, vector<64x32xbf16>, vector<128x32xf32> -> vector<128x32xf32>
    %37 = vector.extract_strided_slice %2 {offsets = [4, 0], sizes = [1, 32], strides = [1, 1]} : vector<8x128xf32> to vector<1x32xf32>
    %38 = vector.broadcast %37 : vector<1x32xf32> to vector<128x32xf32>
    %39 = arith.addf %36, %38 : vector<128x32xf32>
    %cst_17 = arith.constant 0.000000e+00 : f32
    %40 = vector.broadcast %cst_17 : f32 to vector<128x32xf32>
    %41 = arith.maximumf %39, %40 : vector<128x32xf32>
    %42 = arith.truncf %41 : vector<128x32xf32> to vector<128x32xbf16>
    %c1168 = arith.constant 1168 : index
    %c0_18 = arith.constant 0 : index
    %43 = vector.load %arg2[%c1168, %c0_18] : memref<1200x128xbf16, #tpu.memory_space<vmem>>, vector<32x128xbf16>
    %cst_19 = arith.constant dense<0.000000e+00> : vector<128x128xf32>
    %44 = tpu.matmul %42, %43, %cst_19 {dimension_numbers = #tpu.dot_dimension_numbers<[1], [0], [0], [1], [0, 0, 1, 1], [], []>} : vector<128x32xbf16>, vector<32x128xbf16>, vector<128x128xf32> -> vector<128x128xf32>
    %45 = vector.extract_strided_slice %2 {offsets = [5, 0], sizes = [1, 128], strides = [1, 1]} : vector<8x128xf32> to vector<1x128xf32>
    %46 = vector.broadcast %45 : vector<1x128xf32> to vector<128x128xf32>
    %47 = arith.addf %44, %46 : vector<128x128xf32>
    %48 = arith.truncf %47 : vector<128x128xf32> to vector<128x128xbf16>
    %c0_20 = arith.constant 0 : index
    %c0_21 = arith.constant 0 : index
    %49 = vector.load %arg4[%c0_20, %c0_21] : memref<128x128xbf16, #tpu.memory_space<vmem>>, vector<128x128xbf16>
    tpu.vector_store %arg4[%c0_20, %c0_21], %48 {strides = array<i32>} : memref<128x128xbf16, #tpu.memory_space<vmem>>, vector<128x128xbf16>,
    return
  }
  func.func @transform_0(%arg0: i32) -> (i32, i32) {
    %c0_i32 = arith.constant 0 : i32
    %c0_i32_0 = arith.constant 0 : i32
    return %arg0, %c0_i32 : i32, i32
  }
  func.func @transform_1(%arg0: i32) -> (i32, i32) {
    %c0_i32 = arith.constant 0 : i32
    %c0_i32_0 = arith.constant 0 : i32
    %c0_i32_1 = arith.constant 0 : i32
    return %c0_i32, %c0_i32_0 : i32, i32
  }
  func.func @transform_2(%arg0: i32) -> (i32, i32) {
    %c0_i32 = arith.constant 0 : i32
    %c0_i32_0 = arith.constant 0 : i32
    %c0_i32_1 = arith.constant 0 : i32
    return %c0_i32, %c0_i32_0 : i32, i32
  }
  func.func @transform_3(%arg0: i32) -> (i32, i32) {
    %c0_i32 = arith.constant 0 : i32
    %c0_i32_0 = arith.constant 0 : i32
    return %arg0, %c0_i32 : i32, i32
  }
}

</mosaic_0001>

<bundles_post_ra>
// kernel: tpu_custom_call.1
= control target key start
LH: loop header
LB: loop body
LE: loop exit
PB: predicated region body
PF: predicated region fallthrough
CT: control target
= control target key end

     0   :  { %8 = vsyncpa [#allocation3], 0  ;;  %s3619_s0 = inlined_call_operand.vmem [shape: f32[256,784], index: 0, kind: input, shape index: {}]   ;;  %s3620_s1 = inlined_call_operand.vmem [shape: bf16[1200,128], index: 1, kind: input, shape index: {}]   ;;  %s3621_s2 = inlined_call_operand.vmem [shape: f32[8,128], index: 2, kind: input, shape index: {}]   ;;  %s3622_s3 = inlined_call_operand.hbm [shape: bf16[256,128], index: 3, kind: output, shape index: {}]  }
   0x1   :  { %10 = vsyncpa [#allocation3 + $0x1], 0  ;;  %s3038_s12 = smov 0   ;;  %s3040_s13 = smov 0  }
   0x2   :  { %s3042_s14 = smov 0   ;;  %s3044_s15 = smov 0  }
   0x3 LB: > { %s3059_s16 = sadd.s32 4294967295, %s3013_s15   ;;  %s2217_s17 = sadd.s32 4294967294, %s3013_s15   ;;  %s3013_s15 = sphi %s3044_s15, %s3628_s15   ;;  %s3009_s14 = sphi %s3042_s14, %s3627_s14   ;;  %s3005_s13 = sphi %s3040_s13, %s3626_s13   ;;  %s3001_s12 = sphi %s3038_s12, %s3625_s12  }
   0x4   : > { %s3063_s18 = sadd.s32 1, %s3013_s15   ;;  %s91_s19 = sadd.s32 1, %s3009_s14 }
   0x5   : > { %s88_s20 = ssub.s32 %s3013_s15, %s3063_s18  ;;  %p101_p0 = scmp.ne.s32.totalorder %s3009_s14, %s3005_s13 }
   0x6   : > { %p89_p1 = scmp.eq.s32.totalorder %s88_s20, 0  ;;  %p102_p2 = scmp.eq.s32.totalorder %s3059_s16, 1 }
   0x7   : > { %p107_p3 = scmp.ne.s32.totalorder %s3005_s13, %s3001_s12  ;;  %p108_p4 = scmp.eq.s32.totalorder %s2217_s17, 1 }
   0x8   : > { %s3074_s21 = scalar_select %p89_p1, %s3009_s14, %s91_s19  }
   0x9   : > { %p3076_p5 = por %p102_p2, %p101_p0  ;;  %p3080_p6 = por %p108_p4, %p107_p3 }
   0xa   : > { %p2220_p7 = scmp.ge.s32.totalorder %s3013_s15, 1  ;;  %p142_p8 = scmp.lt.s32.totalorder %s3013_s15, 3 }
   0xc   : > { %p143_p9 = pnand %p2220_p7, %p142_p8 }
   0xd   : > { %v2875_v0 = vld [vmem:[%s3620_s1 + $0x40] sm:$0xff] (!%p143_p9)   ;;  %v2879_v4 = vld [vmem:[%s3620_s1 + $0x48] sm:$0xff] (!%p143_p9)   ;;  %v2883_v8 = vld [vmem:[%s3620_s1 + $0x50] sm:$0xff] (!%p143_p9)   ;;  %s2222_s7 = sshll.u32 (!%p143_p9), %s3059_s16, 4  ;;  %vm741_vm0 = vcmask (!%p143_p9), 130048   ;;  %vm1592_vm1 = vcmask (!%p143_p9), 523264  }
   0xe   : > { %146 = sbr.rel (%p143_p9) target bundleno = 1513 (0x5e9), region = 32  ;;  %v2876_v1 = vld [vmem:[%s3620_s1] sm:$0xff] (!%p143_p9)   ;;  %2416 = vmatprep.subr.bf16.mxu0 (!%p143_p9), %v2875_v0  ;;  %v2880_v5 = vld [vmem:[%s3620_s1 + $0x8] sm:$0xff] (!%p143_p9)   ;;  %v2884_v9 = vld [vmem:[%s3620_s1 + $0x10] sm:$0xff] (!%p143_p9)   ;;  %p168_p10 = scmp.lt.s32.totalorder (!%p143_p9), %s2222_s7, 31  ;;  %vm1939_vm2 = vcmask (!%p143_p9), 261120  }
   0xf   : > { %v2877_v2 = vld [vmem:[%s3620_s1 + $0xc0] sm:$0xff] (!%p143_p9)   ;;  %2417 = vmatpush3.bf16.msra.mxu0 (!%p143_p9), %v2876_v1  ;;  %v2881_v6 = vld [vmem:[%s3620_s1 + $0xc8] sm:$0xff] (!%p143_p9)   ;;  %v2885_v10 = vld [vmem:[%s3620_s1 + $0xd0] sm:$0xff] (!%p143_p9)   ;;  %s164_s24 = sand.u32 (!%p143_p9), 1, %s3005_s13   ;;  %s2368_s27 = sshll.u32 (!%p143_p9), %s3059_s16, 10 }
  0x10   : > { %v2878_v3 = vld [vmem:[%s3620_s1 + $0x80] sm:$0xff] (!%p143_p9)   ;;  %2480 = vmatprep.subr.bf16.mxu1 (!%p143_p9), %v2877_v2  ;;  %2418 = vmatprep.subr.bf16.mxu0 (!%p143_p9), %v2879_v4  ;;  %v2882_v7 = vld [vmem:[%s3620_s1 + $0x88] sm:$0xff] (!%p143_p9)   ;;  %v2886_v11 = vld [vmem:[%s3620_s1 + $0x90] sm:$0xff] (!%p143_p9)   ;;  %s2221_s25 = sshll.u32 (!%p143_p9), %s164_s24, 6  ;;  %s3570_s30 = scalar_lea.hbm (!%p143_p9), %s3622_s3, %s2368_s27 }
  0x11   : > { %2481 = vmatpush3.bf16.msra.mxu1 (!%p143_p9), %v2878_v3  ;;  %v2887_v12 = vld [vmem:[%s3620_s1 + $0x58] sm:$0xff] (!%p143_p9)   ;;  %v2891_v16 = vld [vmem:[%s3620_s1 + $0x60] sm:$0xff] (!%p143_p9)   ;;  %v2895_v20 = vld [vmem:[%s3620_s1 + $0x68] sm:$0xff] (!%p143_p9)   ;;  %s3557_s26 = scalar_lea.vmem (!%p143_p9), [#allocation2], %s2221_s25  ;;  %s3578_s16 = scalar_lea.sflag (!%p143_p9), [#allocation3], %s164_s24 }
  0x12   : > { %2482 = vmatprep.subr.bf16.mxu1 (!%p143_p9), %v2881_v6  ;;  %v2888_v13 = vld [vmem:[%s3620_s1 + $0x18] sm:$0xff] (!%p143_p9)   ;;  %v2892_v17 = vld [vmem:[%s3620_s1 + $0x20] sm:$0xff] (!%p143_p9)   ;;  %v2896_v21 = vld [vmem:[%s3620_s1 + $0x28] sm:$0xff] (!%p143_p9)   ;;  %s3015_s4 = smov (!%p143_p9), [#allocation2]  }
  0x13   : > { %2419 = vmatpush3.bf16.msra.mxu0 (!%p143_p9), %v2880_v5  ;;  %v2889_v14 = vld [vmem:[%s3620_s1 + $0xd8] sm:$0xff] (!%p143_p9)   ;;  %v2893_v18 = vld [vmem:[%s3620_s1 + $0xe0] sm:$0xff] (!%p143_p9)   ;;  %v2897_v22 = vld [vmem:[%s3620_s1 + $0xe8] sm:$0xff] (!%p143_p9)   ;;  %s2955_s6 = sshll.u32 (!%p143_p9), %s3015_s4, 4  ;;  %s2956_s6 = int_to_ptr.vmem [resolvable:$false] %s2955_s6 }
  0x14   : > { %2420 = vmatprep.subr.bf16.mxu0 (!%p143_p9), %v2883_v8  ;;  %v2890_v15 = vld [vmem:[%s3620_s1 + $0x98] sm:$0xff] (!%p143_p9)   ;;  %v2894_v19 = vld [vmem:[%s3620_s1 + $0xa0] sm:$0xff] (!%p143_p9)   ;;  %v2898_v23 = vld [vmem:[%s3620_s1 + $0xa8] sm:$0xff] (!%p143_p9)   ;;  %s2957_s8 = scalar_lea.vmem (!%p143_p9), %s2956_s6, 2048 }
  0x15   : > { %2483 = vmatpush3.bf16.msra.mxu1 %v2882_v7  ;;  %s3630_s7 = smov (!%p168_p10, %s2222_s7), 31  ;;  %v2899_v24 = vld [vmem:[%s3620_s1 + $0x70] sm:$0xff]   ;;  %v2903_v28 = vld [vmem:[%s3620_s1 + $0x78] sm:$0xff]   ;;  %v2907_v38 = vld [vmem:[%s3620_s1 + $0x140] sm:$0xff]  }
  0x16   : > { %2484 = vmatprep.subr.bf16.mxu1 %v2885_v10  ;;  %s2833_s19 = smul.u32 56, %s3630_s7  ;;  %v2900_v25 = vld [vmem:[%s3620_s1 + $0x30] sm:$0xff]   ;;  %v2904_v29 = vld [vmem:[%s3620_s1 + $0x38] sm:$0xff]   ;;  %v2908_v42 = vld [vmem:[%s3620_s1 + $0x100] sm:$0xff]  }
  0x17   : > { %2421 = vmatpush3.bf16.msra.mxu0 %v2884_v9  ;;  %v2901_v26 = vld [vmem:[%s3620_s1 + $0xf0] sm:$0xff]   ;;  %v2905_v30 = vld [vmem:[%s3620_s1 + $0xf8] sm:$0xff]   ;;  %v2909_v51 = vld [vmem:[%s3620_s1 + $0x148] sm:$0xff]  }
  0x18   : > { %2422 = vmatprep.subr.bf16.mxu0 %v2887_v12  ;;  %v2902_v27 = vld [vmem:[%s3620_s1 + $0xb0] sm:$0xff]   ;;  %s3177_s5 = scalar_lea.vmem %s3619_s0, %s2833_s19  ;;  %v2906_v34 = vld [vmem:[%s3620_s1 + $0xb8] sm:$0xff]   ;;  %v2910_v56 = vld [vmem:[%s3620_s1 + $0x108] sm:$0xff]  }
  0x19   : > { %2485 = vmatpush3.bf16.msra.mxu1 %v2886_v11  ;;  %v177_v31 = vld [vmem:[%s3177_s5 + $0x8] sm:$0xff]  ;;  %v184_v32 = vld [vmem:[%s3177_s5 + $0x40] sm:$0xff]  ;;  %v183_v36 = vld [vmem:[%s3177_s5 + $0x38] sm:$0xff] }
  0x1a   : > { %2486 = vmatprep.subr.bf16.mxu1 %v2889_v14  ;;  %v289_v33 = vpack.c.bf16 %v184_v32, %v177_v31  ;;  %v176_v35 = vld [vmem:[%s3177_s5] sm:$0xff]  ;;  %v179_v39 = vld [vmem:[%s3177_s5 + $0x18] sm:$0xff]  ;;  %v186_v40 = vld [vmem:[%s3177_s5 + $0x50] sm:$0xff] }
  0x1b   : > { %2423 = vmatpush3.bf16.msra.mxu0 %v2888_v13  ;;  %v288_v37 = vpack.c.bf16 %v183_v36, %v176_v35  ;;  %v291_v41 = vpack.c.bf16 %v186_v40, %v179_v39  ;;  %v178_v43 = vld [vmem:[%s3177_s5 + $0x10] sm:$0xff]  ;;  %v185_v44 = vld [vmem:[%s3177_s5 + $0x48] sm:$0xff]  ;;  %v191_v45 = vld [vmem:[%s3177_s5 + $0x78] sm:$0xff] }
  0x1c   : > { %2424 = vmatprep.subr.bf16.mxu0 %v2891_v16  ;;  %798 = vmatprep.mubr.bf16.mxu0 %v289_v33  ;;  %v290_v46 = vpack.c.bf16 %v185_v44, %v178_v43  ;;  %v198_v47 = vld [vmem:[%s3177_s5 + $0xb0] sm:$0xff]  ;;  %v197_v49 = vld [vmem:[%s3177_s5 + $0xa8] sm:$0xff]  ;;  %v200_v53 = vld [vmem:[%s3177_s5 + $0xc0] sm:$0xff] }
  0x1d   : > { %2487 = vmatpush3.bf16.msra.mxu1 %v2890_v15  ;;  %895 = vmatprep.mubr.bf16.mxu1 %v291_v41  ;;  %v190_v48 = vld [vmem:[%s3177_s5 + $0x70] sm:$0xff]  ;;  %v296_v50 = vpack.c.bf16 %v198_v47, %v191_v45  ;;  %v193_v52 = vld [vmem:[%s3177_s5 + $0x88] sm:$0xff]  ;;  %v192_v57 = vld [vmem:[%s3177_s5 + $0x80] sm:$0xff] }
  0x1e   : > { %2488 = vmatprep.subr.bf16.mxu1 %v2893_v18  ;;  %v295_v54 = vpack.c.bf16 %v197_v49, %v190_v48  ;;  %v298_v55 = vpack.c.bf16 %v200_v53, %v193_v52  ;;  %v199_v58 = vld [vmem:[%s3177_s5 + $0xb8] sm:$0xff]  ;;  %v205_v59 = vld [vmem:[%s3177_s5 + $0xe8] sm:$0xff]  ;;  %v212_v60 = vld [vmem:[%s3177_s5 + $0x120] sm:$0xff] }
  0x1f   : > { %2425 = vmatpush3.bf16.msra.mxu0 %v2892_v17  ;;  %v303_v61 = vpack.c.bf16 %v212_v60, %v205_v59  ;;  %v297_v62 = vpack.c.bf16 %v199_v58, %v192_v57  ;;  %v2911_v63 = vld [vmem:[%s3620_s1 + $0x150] sm:$0xff]   ;;  %v207_v0 = vld [vmem:[%s3177_s5 + $0xf8] sm:$0xff]  ;;  %v204_v2 = vld [vmem:[%s3177_s5 + $0xe0] sm:$0xff] }
  0x20   : > { %2426 = vmatprep.subr.bf16.mxu0 %v2895_v20  ;;  %v214_v1 = vld [vmem:[%s3177_s5 + $0x130] sm:$0xff]  ;;  %v211_v3 = vld [vmem:[%s3177_s5 + $0x118] sm:$0xff]  ;;  %v213_v9 = vld [vmem:[%s3177_s5 + $0x128] sm:$0xff] }
  0x21   : > { %2489 = vmatpush3.bf16.msra.mxu1 %v2894_v19  ;;  %v305_v4 = vpack.c.bf16 %v214_v1, %v207_v0  ;;  %v2912_v5 = vld [vmem:[%s3620_s1 + $0x110] sm:$0xff]   ;;  %v219_v7 = vld [vmem:[%s3177_s5 + $0x158] sm:$0xff]  ;;  %v302_v10 = vpack.c.bf16 %v211_v3, %v204_v2  ;;  %v221_v12 = vld [vmem:[%s3177_s5 + $0x168] sm:$0xff] }
  0x22   : > { %2490 = vmatprep.subr.bf16.mxu1 %v2897_v22  ;;  %v206_v6 = vld [vmem:[%s3177_s5 + $0xf0] sm:$0xff]  ;;  %v2913_v11 = vld [vmem:[%s3620_s1 + $0x158] sm:$0xff]   ;;  %v228_v13 = vld [vmem:[%s3177_s5 + $0x1a0] sm:$0xff] }
  0x23   : > { %2427 = vmatpush3.bf16.msra.mxu0 %v2896_v21  ;;  %v226_v8 = vld [vmem:[%s3177_s5 + $0x190] sm:$0xff]  ;;  %v2914_v15 = vld [vmem:[%s3620_s1 + $0x118] sm:$0xff]   ;;  %v304_v16 = vpack.c.bf16 %v213_v9, %v206_v6  ;;  %v312_v18 = vpack.c.bf16 %v228_v13, %v221_v12  ;;  %v2915_v19 = vld [vmem:[%s3620_s1 + $0x160] sm:$0xff]  }
  0x24   : > { %2428 = vmatprep.subr.bf16.mxu0 %v2899_v24  ;;  %v310_v14 = vpack.c.bf16 %v226_v8, %v219_v7  ;;  %v218_v17 = vld [vmem:[%s3177_s5 + $0x150] sm:$0xff]  ;;  %v225_v20 = vld [vmem:[%s3177_s5 + $0x188] sm:$0xff]  ;;  %v240_v22 = vld [vmem:[%s3177_s5 + $0x200] sm:$0xff] }
  0x25   : > { %2491 = vmatpush3.bf16.msra.mxu1 %v2898_v23  ;;  %v233_v21 = vld [vmem:[%s3177_s5 + $0x1c8] sm:$0xff]  ;;  %v2916_v23 = vld [vmem:[%s3620_s1 + $0x120] sm:$0xff]   ;;  %v309_v24 = vpack.c.bf16 %v225_v20, %v218_v17  ;;  %v239_v36 = vld [vmem:[%s3177_s5 + $0x1f8] sm:$0xff] }
  0x26   : > { %2492 = vmatprep.subr.bf16.mxu1 %v2901_v26  ;;  %v227_v26 = vld [vmem:[%s3177_s5 + $0x198] sm:$0xff]  ;;  %v2918_v31 = vld [vmem:[%s3620_s1 + $0x168] sm:$0xff]   ;;  %v232_v35 = vld [vmem:[%s3177_s5 + $0x1c0] sm:$0xff] }
  0x27   : > { %2429 = vmatpush3.bf16.msra.mxu0 %v2900_v25  ;;  %v220_v25 = vld [vmem:[%s3177_s5 + $0x160] sm:$0xff]  ;;  %v234_v39 = vld [vmem:[%s3177_s5 + $0x1d0] sm:$0xff]  ;;  %v241_v40 = vld [vmem:[%s3177_s5 + $0x208] sm:$0xff] }
  0x28   : > { %2430 = vmatprep.subr.bf16.mxu0 %v2903_v28  ;;  %v317_v28 = vpack.c.bf16 %v240_v22, %v233_v21  ;;  %v311_v32 = vpack.c.bf16 %v227_v26, %v220_v25  ;;  %v2920_v41 = vld [vmem:[%s3620_s1 + $0x170] sm:$0xff]   ;;  %v249_v45 = vld [vmem:[%s3177_s5 + $0x248] sm:$0xff]  ;;  %v318_v47 = vpack.c.bf16 %v241_v40, %v234_v39  ;;  %v2922_v48 = vld [vmem:[%s3620_s1 + $0x178] sm:$0xff]  }
  0x29   : > { %2493 = vmatpush3.bf16.msra.mxu1 %v2902_v27  ;;  %v2917_v27 = vld [vmem:[%s3620_s1 + $0x180] sm:$0xff]   ;;  %v2921_v43 = vld [vmem:[%s3620_s1 + $0x130] sm:$0xff]   ;;  %v2923_v52 = vld [vmem:[%s3620_s1 + $0x138] sm:$0xff]  }
  0x2a   : > { %2494 = vmatprep.subr.bf16.mxu1 %v2905_v30  ;;  %v242_v30 = vld [vmem:[%s3177_s5 + $0x210] sm:$0xff]  ;;  %v261_v53 = vld [vmem:[%s3177_s5 + $0x2a8] sm:$0xff]  ;;  %v255_v57 = vld [vmem:[%s3177_s5 + $0x278] sm:$0xff] }
  0x2b   : > { %2431 = vmatpush3.bf16.msra.mxu0 %v2904_v29  ;;  %v235_v29 = vld [vmem:[%s3177_s5 + $0x1d8] sm:$0xff]  ;;  %v246_v49 = vld [vmem:[%s3177_s5 + $0x230] sm:$0xff]  ;;  %v277_v7 = vld [vmem:[%s3177_s5 + $0x328] sm:$0xff] }
  0x2c   : > { %2544 = vmatprep.subr.bf16.mxu0 %v2907_v38  ;;  %v319_v33 = vpack.c.bf16 %v242_v30, %v235_v29  ;;  %v254_v38 = vld [vmem:[%s3177_s5 + $0x270] sm:$0xff]  ;;  %v263_v59 = vld [vmem:[%s3177_s5 + $0x2b8] sm:$0xff]  ;;  %v284_v8 = vld [vmem:[%s3177_s5 + $0x360] sm:$0xff] }
  0x2d   : > { %2495 = vmatpush3.bf16.msra.mxu1 %v2906_v34  ;;  %v2919_v34 = vld [vmem:[%s3620_s1 + $0x128] sm:$0xff]   ;;  %v270_v60 = vld [vmem:[%s3177_s5 + $0x2f0] sm:$0xff]  ;;  %v267_v0 = vld [vmem:[%s3177_s5 + $0x2d8] sm:$0xff] }
  0x2e   : > { %799 = vmatmul.mubr.bf16.vlgmr.msra.gmra.mrb[0].mxu0 %v288_v37  ;;  %2683 = vmatprep.subr.bf16.mxu1 %v2917_v27  ;;  %v247_v37 = vld [vmem:[%s3177_s5 + $0x238] sm:$0xff]  ;;  %v282_v2 = vld [vmem:[%s3177_s5 + $0x350] sm:$0xff]  ;;  %v281_v12 = vld [vmem:[%s3177_s5 + $0x348] sm:$0xff] }
  0x2f   : > { %2545 = vmatpush3.bf16.msra.mxu0 %v2908_v42  ;;  %806 = vmatprep.mubr.bf16.mxu0 %v296_v50  ;;  %v316_v42 = vpack.c.bf16 %v239_v36, %v232_v35  ;;  %v324_v44 = vpack.c.bf16 %v254_v38, %v247_v37  ;;  %v275_v1 = vld [vmem:[%s3177_s5 + $0x318] sm:$0xff]  ;;  %v181_v13 = vld [vmem:[%s3177_s5 + $0x28] sm:$0xff]  ;;  %v182_v17 = vld [vmem:[%s3177_s5 + $0x30] sm:$0xff] }
  0x30   : > { %896 = vmatmul.mubr.bf16.vlgmr.msra.gmra.mrb[0].mxu1 %v290_v46  ;;  %2546 = vmatprep.subr.bf16.mxu0 %v2909_v51  ;;  %v256_v46 = vld [vmem:[%s3177_s5 + $0x280] sm:$0xff]  ;;  %v253_v51 = vld [vmem:[%s3177_s5 + $0x268] sm:$0xff]  ;;  %v338_v6 = vpack.c.bf16 %v282_v2, %v275_v1  ;;  %v195_v25 = vld [vmem:[%s3177_s5 + $0x98] sm:$0xff] }
  0x31   : > { %903 = vmatprep.mubr.bf16.mxu1 %v298_v55  ;;  %2684 = vmatpush3.bf16.msra.mxu1 %v2917_v27  ;;  %v326_v50 = vpack.c.bf16 %v256_v46, %v249_v45  ;;  %v323_v55 = vpack.c.bf16 %v253_v51, %v246_v49  ;;  %v180_v22 = vld [vmem:[%s3177_s5 + $0x20] sm:$0xff]  ;;  %v202_v26 = vld [vmem:[%s3177_s5 + $0xd0] sm:$0xff]  ;;  %v217_v30 = vld [vmem:[%s3177_s5 + $0x148] sm:$0xff] }
  0x32   : > { %v196_v27 = vld [vmem:[%s3177_s5 + $0xa0] sm:$0xff]  ;;  %v210_v29 = vld [vmem:[%s3177_s5 + $0x110] sm:$0xff]  ;;  %v201_v35 = vld [vmem:[%s3177_s5 + $0xc8] sm:$0xff] }
  0x33   : > { %2547 = vmatpush3.bf16.msra.mxu0 %v2910_v56  ;;  %v248_v56 = vld [vmem:[%s3177_s5 + $0x240] sm:$0xff]  ;;  %v209_v36 = vld [vmem:[%s3177_s5 + $0x108] sm:$0xff]  ;;  %v308_v38 = vpack.c.bf16 %v217_v30, %v210_v29  ;;  %v223_v49 = vld [vmem:[%s3177_s5 + $0x178] sm:$0xff] }
  0x34   : > { %2548 = vmatprep.subr.bf16.mxu0 %v2911_v63  ;;  %v260_v63 = vld [vmem:[%s3177_s5 + $0x2a0] sm:$0xff]  ;;  %v287_v1 = vld [vmem:[%s3177_s5 + $0x378] sm:$0xff]  ;;  %v2928_v29 = vld [vmem:[%s3620_s1 + $0x1a8] sm:$0xff]  }
  0x35   : > { %v330_v3 = vpack.c.bf16 %v267_v0, %v260_v63  ;;  %v216_v37 = vld [vmem:[%s3177_s5 + $0x140] sm:$0xff]  ;;  %v2929_v30 = vld [vmem:[%s3620_s1 + $0x1b0] sm:$0xff]  }
  0x36   : > { %807 = vmatmul.mubr.bf16.gmra.mrb[4].mxu0 %v295_v54  ;;  %v268_v54 = vld [vmem:[%s3177_s5 + $0x2e0] sm:$0xff] }
  0x37   : > { %814 = vmatprep.mubr.bf16.mxu0 %v303_v61  ;;  %2549 = vmatpush3.bf16.msra.mxu0 %v2912_v5  ;;  %v331_v58 = vpack.c.bf16 %v268_v54, %v261_v53  ;;  %v325_v61 = vpack.c.bf16 %v255_v57, %v248_v56  ;;  %v269_v5 = vld [vmem:[%s3177_s5 + $0x2e8] sm:$0xff]  ;;  %v224_v40 = vld [vmem:[%s3177_s5 + $0x180] sm:$0xff]  ;;  %v259_v53 = vld [vmem:[%s3177_s5 + $0x298] sm:$0xff] }
  0x38   : > { %904 = vmatmul.mubr.bf16.gmra.mrb[4].mxu1 %v297_v62  ;;  %2550 = vmatprep.subr.bf16.mxu0 %v2913_v11  ;;  %v333_v62 = vpack.c.bf16 %v270_v60, %v263_v59  ;;  %v274_v11 = vld [vmem:[%s3177_s5 + $0x310] sm:$0xff]  ;;  %v273_v56 = vld [vmem:[%s3177_s5 + $0x308] sm:$0xff]  ;;  %v280_v0 = vld [vmem:[%s3177_s5 + $0x340] sm:$0xff] }
  0x39   : > { %911 = vmatprep.mubr.bf16.mxu1 %v305_v4  ;;  %v262_v4 = vld [vmem:[%s3177_s5 + $0x2b0] sm:$0xff]  ;;  %v229_v60 = vld [vmem:[%s3177_s5 + $0x1a8] sm:$0xff] }
  0x3a   : > { %v332_v9 = vpack.c.bf16 %v269_v5, %v262_v4  ;;  %v222_v59 = vld [vmem:[%s3177_s5 + $0x170] sm:$0xff]  ;;  %v236_v4 = vld [vmem:[%s3177_s5 + $0x1e0] sm:$0xff]  ;;  %v243_v5 = vld [vmem:[%s3177_s5 + $0x218] sm:$0xff] }
  0x3b   : > { %2551 = vmatpush3.bf16.msra.mxu0 %v2914_v15  ;;  %v283_v15 = vld [vmem:[%s3177_s5 + $0x358] sm:$0xff]  ;;  %v313_v63 = vpack.c.bf16 %v229_v60, %v222_v59 }
  0x3c   : > { %2552 = vmatprep.subr.bf16.mxu0 %v2915_v19  ;;  %v337_v19 = vpack.c.bf16 %v281_v12, %v274_v11  ;;  %v257_v11 = vld [vmem:[%s3177_s5 + $0x288] sm:$0xff]  ;;  %v2934_v60 = vld [vmem:[%s3620_s1 + $0x1d8] sm:$0xff]  }
  0x3d   : > { %v265_v12 = vld [vmem:[%s3177_s5 + $0x2c8] sm:$0xff] }
  0x3e   : > { %815 = vmatmul.mubr.bf16.gmra.mrb[8].mxu0 %v302_v10  ;;  %v340_v10 = vpack.c.bf16 %v284_v8, %v277_v7  ;;  %v258_v7 = vld [vmem:[%s3177_s5 + $0x290] sm:$0xff]  ;;  %v320_v8 = vpack.c.bf16 %v243_v5, %v236_v4 }
  0x3f   : > { %822 = vmatprep.mubr.bf16.mxu0 %v310_v14  ;;  %2553 = vmatpush3.bf16.msra.mxu0 %v2916_v23  ;;  %v276_v14 = vld [vmem:[%s3177_s5 + $0x320] sm:$0xff]  ;;  %v187_v23 = vld [vmem:[%s3177_s5 + $0x58] sm:$0xff] }
  0x40   : > { %912 = vmatmul.mubr.bf16.gmra.mrb[8].mxu1 %v304_v16  ;;  %2554 = vmatprep.subr.bf16.mxu0 %v2918_v31  ;;  %v188_v16 = vld [vmem:[%s3177_s5 + $0x60] sm:$0xff]  ;;  %v339_v21 = vpack.c.bf16 %v283_v15, %v276_v14  ;;  %v292_v31 = vpack.c.bf16 %v187_v23, %v180_v22  ;;  %v278_v22 = vld [vmem:[%s3177_s5 + $0x330] sm:$0xff]  ;;  %v285_v23 = vld [vmem:[%s3177_s5 + $0x368] sm:$0xff] }
  0x41   : > { %919 = vmatprep.mubr.bf16.mxu1 %v312_v18  ;;  %v189_v18 = vld [vmem:[%s3177_s5 + $0x68] sm:$0xff]  ;;  %v293_v20 = vpack.c.bf16 %v188_v16, %v181_v13  ;;  %v272_v13 = vld [vmem:[%s3177_s5 + $0x300] sm:$0xff] }
  0x42   : > { %v335_v15 = vpack.c.bf16 %v272_v13, %v265_v12  ;;  %v264_v16 = vld [vmem:[%s3177_s5 + $0x2c0] sm:$0xff] }
  0x43   : > { %2555 = vmatpush3.bf16.msra.mxu0 %v2919_v34  ;;  %v194_v34 = vld [vmem:[%s3177_s5 + $0x90] sm:$0xff] }
  0x44   : > { %2556 = vmatprep.subr.bf16.mxu0 %v2920_v41  ;;  %v299_v39 = vpack.c.bf16 %v201_v35, %v194_v34  ;;  %v231_v41 = vld [vmem:[%s3177_s5 + $0x1b8] sm:$0xff] }
  0x45   : > { %v315_v45 = vpack.c.bf16 %v231_v41, %v224_v40 }
  0x46   : > { %823 = vmatmul.mubr.bf16.gmra.mrb[12].mxu0 %v309_v24  ;;  %v294_v24 = vpack.c.bf16 %v189_v18, %v182_v17  ;;  %v271_v17 = vld [vmem:[%s3177_s5 + $0x2f8] sm:$0xff] }
  0x47   : > { %830 = vmatprep.mubr.bf16.mxu0 %v317_v28  ;;  %2557 = vmatpush3.bf16.msra.mxu0 %v2921_v43  ;;  %v203_v28 = vld [vmem:[%s3177_s5 + $0xd8] sm:$0xff]  ;;  %v238_v43 = vld [vmem:[%s3177_s5 + $0x1f0] sm:$0xff] }
  0x48   : > { %920 = vmatmul.mubr.bf16.gmra.mrb[12].mxu1 %v311_v32  ;;  %2558 = vmatprep.subr.bf16.mxu0 %v2922_v48  ;;  %v300_v32 = vpack.c.bf16 %v202_v26, %v195_v25  ;;  %v215_v48 = vld [vmem:[%s3177_s5 + $0x138] sm:$0xff]  ;;  %v2924_v25 = vld [vmem:[%s3620_s1 + $0x188] sm:$0xff]   ;;  %v2925_v26 = vld [vmem:[%s3620_s1 + $0x190] sm:$0xff]  }
  0x49   : > { %927 = vmatprep.mubr.bf16.mxu1 %v319_v33  ;;  %v301_v33 = vpack.c.bf16 %v203_v28, %v196_v27  ;;  %v279_v18 = vld [vmem:[%s3177_s5 + $0x338] sm:$0xff]  ;;  %2701 = vmatprep.subr.bf16.mxu1 %v2924_v25  ;;  %v2927_v28 = vld [vmem:[%s3620_s1 + $0x1a0] sm:$0xff]  }
  0x4a   : > { %v2926_v27 = vld [vmem:[%s3620_s1 + $0x198] sm:$0xff]  }
  0x4b   : > { %2559 = vmatpush3.bf16.msra.mxu0 %v2923_v52  ;;  %v252_v52 = vld [vmem:[%s3177_s5 + $0x260] sm:$0xff] }
  0x4c   : > { %v329_v57 = vpack.c.bf16 %v259_v53, %v252_v52  ;;  %v2933_v52 = vld [vmem:[%s3620_s1 + $0x1d0] sm:$0xff]  }
  0x4e   : > { %831 = vmatmul.mubr.bf16.gmra.mrb[16].mxu0 %v316_v42  ;;  %v307_v42 = vpack.c.bf16 %v216_v37, %v209_v36  ;;  %v3389_v36 = vld [vmem:[%s3621_s2] sm:$0xff] }
  0x4f   : > { %838 = vmatprep.mubr.bf16.mxu0 %v324_v44  ;;  %v245_v44 = vld [vmem:[%s3177_s5 + $0x228] sm:$0xff] }
  0x50   : > { %928 = vmatmul.mubr.bf16.gmra.mrb[16].mxu1 %v318_v47  ;;  %v322_v46 = vpack.c.bf16 %v245_v44, %v238_v43  ;;  %v208_v47 = vld [vmem:[%s3177_s5 + $0x100] sm:$0xff] }
  0x51   : > { %935 = vmatprep.mubr.bf16.mxu1 %v326_v50  ;;  %v230_v50 = vld [vmem:[%s3177_s5 + $0x1b0] sm:$0xff]  ;;  %v306_v51 = vpack.c.bf16 %v215_v48, %v208_v47 }
  0x52   : > { %v314_v54 = vpack.c.bf16 %v230_v50, %v223_v49 }
  0x56   : > { %839 = vmatmul.mubr.bf16.gmra.mrb[20].mxu0 %v323_v55  ;;  %v266_v55 = vld [vmem:[%s3177_s5 + $0x2d0] sm:$0xff] }
  0x57   : > { %846 = vmatprep.mubr.bf16.mxu0 %v331_v58  ;;  %v336_v58 = vpack.c.bf16 %v273_v56, %v266_v55 }
  0x58   : > { %936 = vmatmul.mubr.bf16.gmra.mrb[20].mxu1 %v325_v61  ;;  %v237_v61 = vld [vmem:[%s3177_s5 + $0x1e8] sm:$0xff] }
  0x59   : > { %943 = vmatprep.mubr.bf16.mxu1 %v333_v62  ;;  %v244_v62 = vld [vmem:[%s3177_s5 + $0x220] sm:$0xff] }
  0x5a   : > { %v321_v2 = vpack.c.bf16 %v244_v62, %v237_v61 }
  0x5e   : > { %847 = vmatmul.mubr.bf16.gmra.mrb[24].mxu0 %v330_v3  ;;  %v343_v3 = vpack.c.bf16 %v287_v1, %v280_v0 }
  0x5f   : > { %854 = vmatprep.mubr.bf16.mxu0 %v338_v6  ;;  %v251_v6 = vld [vmem:[%s3177_s5 + $0x258] sm:$0xff] }
  0x60   : > { %944 = vmatmul.mubr.bf16.gmra.mrb[24].mxu1 %v332_v9  ;;  %v328_v9 = vpack.c.bf16 %v258_v7, %v251_v6  ;;  %v2935_v6 = vld [vmem:[%s3620_s1 + $0x1e0] sm:$0xff]  }
  0x61   : > { %951 = vmatprep.mubr.bf16.mxu1 %v340_v10  ;;  %v250_v10 = vld [vmem:[%s3177_s5 + $0x250] sm:$0xff] }
  0x62   : > { %v327_v14 = vpack.c.bf16 %v257_v11, %v250_v10 }
  0x66   : > { %855 = vmatmul.mubr.bf16.gmra.mrb[28].mxu0 %v337_v19  ;;  %v286_v19 = vld [vmem:[%s3177_s5 + $0x370] sm:$0xff]  ;;  %s2155_s5 = sshll.u32 %s3557_s26, 4  ;;  %s3572_s5 = int_to_ptr.vmem [resolvable:$true] %s2155_s5 }
  0x67   : > { %992 = vmatprep.mubr.bf16.mxu0 %v293_v20  ;;  %v334_v20 = vpack.c.bf16 %v271_v17, %v264_v16  ;;  %s2951_s7 = scalar_lea.vmem %s3572_s5, 1024  ;;  %p2958_p0 = scmp.lt.s32.totalorder %s3572_s5, %s2956_s6 }
  0x68   : > { %952 = vmatmul.mubr.bf16.gmra.mrb[28].mxu1 %v339_v21  ;;  %v342_v21 = vpack.c.bf16 %v286_v19, %v279_v18  ;;  %p2952_p11 = scmp.ne.s32.totalorder %s3572_s5, %s2951_s7  ;;  %p2959_p1 = scmp.lt.s32.totalorder %s2957_s8, %s2951_s7 }
  0x69   : > { %2685 = vmatprep.mubr.msk.bf16.mxu1 %vm741_vm0, %v294_v24  ;;  %v341_v24 = vpack.c.bf16 %v285_v23, %v278_v22 }
  0x6a   : > { %p2953_p12 = pnand %p2952_p11, %p3076_p5  ;;  %p2960_p2 = por %p2959_p1, %p2958_p0 }
  0x6c   : > { %p2954_p13 = pneg %p2953_p12 }
  0x6e   : > { %993 = vmatmul.mubr.bf16.vlgmr.msra.gmra.mrb[32].mxu0 %v292_v31  ;;  %v2930_v31 = vld [vmem:[%s3620_s1 + $0x1b8] sm:$0xff]   ;;  %p2961_p3 = pnand %p2960_p2, %p2954_p13 }
  0x6f   : > { %1000 = vmatprep.mubr.bf16.mxu0 %v300_v32  ;;  %v2931_v32 = vld [vmem:[%s3620_s1 + $0x1c0] sm:$0xff]  }
  0x70   : > { %2686 = vmatmul.mubr.msk.bf16.vlgmr.msra.gmra.mrb[32].mxu1 %vm741_vm0, %v301_v33  ;;  %v443_v33 = vlaneseq }
  0x71   : > { %2689 = vmatprep.mubr.msk.bf16.mxu1 %vm741_vm0, %v308_v38  ;;  %2702 = vmatpush3.bf16.msra.mxu1 %v2924_v25 }
  0x72   : > { %2703 = vmatprep.subr.bf16.mxu1 %v2925_v26  ;;  %v3383_v34 = vshrl.u32 %v443_v33, 7 }
  0x74   : > { %v445_v35 = vsub.s32 0, %v3383_v34 }
  0x75   : > { %2704 = vmatpush3.bf16.msra.mxu1 %v2925_v26 }
  0x76   : > { %1001 = vmatmul.mubr.bf16.gmra.mrb[36].mxu0 %v299_v39  ;;  %2705 = vmatprep.subr.bf16.mxu1 %v2926_v27  ;;  %v3392_v38 = vrot.slane %v3389_v36, %v445_v35 }
  0x77   : > { %1008 = vmatprep.mubr.bf16.mxu0 %v307_v42 }
  0x78   : > { %2690 = vmatmul.mubr.msk.bf16.gmra.mrb[36].mxu1 %vm741_vm0, %v315_v45 }
  0x79   : > { %2693 = vmatprep.mubr.msk.bf16.mxu1 %vm741_vm0, %v322_v46  ;;  %2706 = vmatpush3.bf16.msra.mxu1 %v2926_v27 }
  0x7a   : > { %2707 = vmatprep.subr.bf16.mxu1 %v2927_v28 }
  0x7d   : > { %2708 = vmatpush3.bf16.msra.mxu1 %v2927_v28 }
  0x7e   : > { %1009 = vmatmul.mubr.bf16.gmra.mrb[40].mxu0 %v306_v51  ;;  %2709 = vmatprep.subr.bf16.mxu1 %v2928_v29  ;;  %v2932_v51 = vld [vmem:[%s3620_s1 + $0x1c8] sm:$0xff]  }
  0x7f   : > { %1016 = vmatprep.mubr.bf16.mxu0 %v314_v54  ;;  %2733 = vmatprep.subr.bf16.mxu0 %v2932_v51 }
  0x80   : > { %2694 = vmatmul.mubr.msk.bf16.gmra.mrb[40].mxu1 %vm741_vm0, %v329_v57  ;;  %2734 = vmatpush3.bf16.msra.mxu0 %v2932_v51 }
  0x81   : > { %2697 = vmatprep.mubr.msk.bf16.mxu1 %vm741_vm0, %v336_v58  ;;  %2710 = vmatpush3.bf16.msra.mxu1 %v2928_v29 }
  0x82   : > { %2711 = vmatprep.subr.bf16.mxu1 %v2929_v30  ;;  %2735 = vmatprep.subr.bf16.mxu0 %v2933_v52 }
  0x84   : > { %2736 = vmatpush3.bf16.msra.mxu0 %v2933_v52 }
  0x85   : > { %2712 = vmatpush3.bf16.msra.mxu1 %v2929_v30  ;;  %2737 = vmatprep.subr.bf16.mxu0 %v2934_v60 }
  0x86   : > { %1017 = vmatmul.mubr.bf16.gmra.mrb[44].mxu0 %v313_v63  ;;  %2713 = vmatprep.subr.bf16.mxu1 %v2930_v31 }
  0x87   : > { %1024 = vmatprep.mubr.bf16.mxu0 %v321_v2 }
  0x88   : > { %2698 = vmatmul.mubr.msk.bf16.gmra.mrb[44].mxu1 %vm741_vm0, %v343_v3  ;;  %2738 = vmatpush3.bf16.msra.mxu0 %v2934_v60 }
  0x89   : > { %2714 = vmatpush3.bf16.msra.mxu1 %v2930_v31  ;;  %2739 = vmatprep.subr.bf16.mxu0 %v2935_v6 }
  0x8a   : > { %2715 = vmatprep.subr.bf16.mxu1 %v2931_v32 }
  0x8c   : > { %2740 = vmatpush3.bf16.msra.mxu0 %v2935_v6 }
  0x8d   : > { %2716 = vmatpush3.bf16.msra.mxu1 %v2931_v32 }
  0x8e   : > { %1025 = vmatmul.mubr.bf16.gmra.mrb[48].mxu0 %v320_v8 }
  0x8f   : > { %1032 = vmatprep.mubr.bf16.mxu0 %v328_v9 }
  0x96   : > { %1033 = vmatmul.mubr.bf16.gmra.mrb[52].mxu0 %v327_v14  ;;  %v2936_v14 = vld [vmem:[%s3620_s1 + $0x1e8] sm:$0xff]  }
  0x97   : > { %1040 = vmatprep.mubr.bf16.mxu0 %v335_v15  ;;  %2741 = vmatprep.subr.bf16.mxu0 %v2936_v14 }
  0x98   : > { %2742 = vmatpush3.bf16.msra.mxu0 %v2936_v14 }
  0x9e   : > { %1041 = vmatmul.mubr.bf16.gmra.mrb[56].mxu0 %v334_v20 }
  0x9f   : > { %1048 = vmatprep.mubr.bf16.mxu0 %v342_v21 }
  0xa6   : > { %1049 = vmatmul.mubr.bf16.gmra.mrb[60].mxu0 %v341_v24  ;;  %v2937_v24 = vld [vmem:[%s3620_s1 + $0x1f0] sm:$0xff]  }
  0xa7   : > { %2743 = vmatprep.subr.bf16.mxu0 %v2937_v24 }
  0xa8   : > { %2744 = vmatpush3.bf16.msra.mxu0 %v2937_v24 }
 0x101   : > { %v2432_v37 = vpop.f32.mrb[0].mxu0 }
 0x102   : > { %v2433_v39 = vpop.f32.mrb[1].mxu0 }
 0x103   : > { %v2434_v40 = vadd.f32 %v2433_v39, %v2432_v37  ;;  %v2435_v41 = vpop.f32.mrb[2].mxu0  ;;  %v2496_v42 = vpop.f32.mrb[0].mxu1 }
 0x104   : > { %v2436_v43 = vpop.f32.mrb[3].mxu0  ;;  %v2497_v46 = vpop.f32.mrb[1].mxu1 }
 0x105   : > { %v801_v44 = vadd.f32 %v2434_v40, %v3392_v38  ;;  %v2437_v45 = vadd.f32 %v2436_v43, %v2435_v41  ;;  %v2498_v47 = vadd.f32 %v2497_v46, %v2496_v42  ;;  %v2499_v48 = vpop.f32.mrb[2].mxu1 }
 0x106   : > { %v2500_v50 = vpop.f32.mrb[3].mxu1 }
 0x107   : > { %v804_v49 = vadd.f32 %v2437_v45, %v3392_v38  ;;  %v3402_v53 = vadd.f32 %v2498_v47, %v801_v44  ;;  %v2501_v54 = vadd.f32 %v2500_v50, %v2499_v48 }
 0x109   : > { %v2438_v55 = vpop.f32.mrb[4].mxu0  ;;  %v3404_v56 = vadd.f32 %v2501_v54, %v804_v49 }
 0x10a   : > { %v2439_v57 = vpop.f32.mrb[5].mxu0 }
 0x10b   : > { %v2440_v58 = vadd.f32 %v2439_v57, %v2438_v55  ;;  %v2441_v59 = vpop.f32.mrb[6].mxu0  ;;  %v2502_v61 = vpop.f32.mrb[4].mxu1 }
 0x10c   : > { %v2442_v62 = vpop.f32.mrb[7].mxu0  ;;  %v2503_v1 = vpop.f32.mrb[5].mxu1 }
 0x10d   : > { %v809_v63 = vadd.f32 %v2440_v58, %v3392_v38  ;;  %v2443_v0 = vadd.f32 %v2442_v62, %v2441_v59  ;;  %v2504_v2 = vadd.f32 %v2503_v1, %v2502_v61  ;;  %v2505_v3 = vpop.f32.mrb[6].mxu1 }
 0x10e   : > { %v2506_v5 = vpop.f32.mrb[7].mxu1 }
 0x10f   : > { %v812_v4 = vadd.f32 %v2443_v0, %v3392_v38  ;;  %v3414_v7 = vadd.f32 %v2504_v2, %v809_v63  ;;  %v2507_v8 = vadd.f32 %v2506_v5, %v2505_v3 }
 0x111   : > { %v2444_v9 = vpop.f32.mrb[8].mxu0  ;;  %v3416_v10 = vadd.f32 %v2507_v8, %v812_v4 }
 0x112   : > { %v2445_v11 = vpop.f32.mrb[9].mxu0 }
 0x113   : > { %v2446_v12 = vadd.f32 %v2445_v11, %v2444_v9  ;;  %v2447_v13 = vpop.f32.mrb[10].mxu0  ;;  %v2508_v15 = vpop.f32.mrb[8].mxu1 }
 0x114   : > { %v2448_v16 = vpop.f32.mrb[11].mxu0  ;;  %v2509_v19 = vpop.f32.mrb[9].mxu1 }
 0x115   : > { %v817_v17 = vadd.f32 %v2446_v12, %v3392_v38  ;;  %v2449_v18 = vadd.f32 %v2448_v16, %v2447_v13  ;;  %v2510_v20 = vadd.f32 %v2509_v19, %v2508_v15  ;;  %v2511_v21 = vpop.f32.mrb[10].mxu1 }
 0x116   : > { %v2512_v23 = vpop.f32.mrb[11].mxu1 }
 0x117   : > { %v820_v22 = vadd.f32 %v2449_v18, %v3392_v38  ;;  %v3426_v25 = vadd.f32 %v2510_v20, %v817_v17  ;;  %v2513_v26 = vadd.f32 %v2512_v23, %v2511_v21 }
 0x119   : > { %v2450_v27 = vpop.f32.mrb[12].mxu0  ;;  %v3428_v28 = vadd.f32 %v2513_v26, %v820_v22 }
 0x11a   : > { %v2451_v29 = vpop.f32.mrb[13].mxu0 }
 0x11b   : > { %v2452_v30 = vadd.f32 %v2451_v29, %v2450_v27  ;;  %v2453_v31 = vpop.f32.mrb[14].mxu0  ;;  %v2514_v32 = vpop.f32.mrb[12].mxu1 }
 0x11c   : > { %v2454_v33 = vpop.f32.mrb[15].mxu0  ;;  %v2515_v39 = vpop.f32.mrb[13].mxu1 }
 0x11d   : > { %v825_v35 = vadd.f32 %v2452_v30, %v3392_v38  ;;  %v2455_v37 = vadd.f32 %v2454_v33, %v2453_v31  ;;  %v2516_v40 = vadd.f32 %v2515_v39, %v2514_v32  ;;  %v2517_v41 = vpop.f32.mrb[14].mxu1 }
 0x11e   : > { %v2518_v43 = vpop.f32.mrb[15].mxu1 }
 0x11f   : > { %v828_v42 = vadd.f32 %v2455_v37, %v3392_v38  ;;  %v3432_v44 = vadd.f32 %v2516_v40, %v825_v35  ;;  %v2519_v45 = vadd.f32 %v2518_v43, %v2517_v41 }
 0x121   : > { %v2456_v46 = vpop.f32.mrb[16].mxu0  ;;  %v3434_v47 = vadd.f32 %v2519_v45, %v828_v42 }
 0x122   : > { %v2457_v48 = vpop.f32.mrb[17].mxu0 }
 0x123   : > { %v2458_v49 = vadd.f32 %v2457_v48, %v2456_v46  ;;  %v2459_v50 = vpop.f32.mrb[18].mxu0  ;;  %v2520_v51 = vpop.f32.mrb[16].mxu1 }
 0x124   : > { %v2460_v52 = vpop.f32.mrb[19].mxu0  ;;  %v2521_v57 = vpop.f32.mrb[17].mxu1 }
 0x125   : > { %v833_v54 = vadd.f32 %v2458_v49, %v3392_v38  ;;  %v2461_v55 = vadd.f32 %v2460_v52, %v2459_v50  ;;  %v2522_v58 = vadd.f32 %v2521_v57, %v2520_v51  ;;  %v2523_v59 = vpop.f32.mrb[18].mxu1 }
 0x126   : > { %v2524_v61 = vpop.f32.mrb[19].mxu1 }
 0x127   : > { %v836_v60 = vadd.f32 %v2461_v55, %v3392_v38  ;;  %v3438_v62 = vadd.f32 %v2522_v58, %v833_v54  ;;  %v2525_v63 = vadd.f32 %v2524_v61, %v2523_v59 }
 0x129   : > { %v2462_v0 = vpop.f32.mrb[20].mxu0  ;;  %v3440_v1 = vadd.f32 %v2525_v63, %v836_v60 }
 0x12a   : > { %v2463_v2 = vpop.f32.mrb[21].mxu0 }
 0x12b   : > { %v2464_v3 = vadd.f32 %v2463_v2, %v2462_v0  ;;  %v2465_v4 = vpop.f32.mrb[22].mxu0  ;;  %v2526_v5 = vpop.f32.mrb[20].mxu1 }
 0x12c   : > { %v2466_v6 = vpop.f32.mrb[23].mxu0  ;;  %v2527_v11 = vpop.f32.mrb[21].mxu1 }
 0x12d   : > { %v841_v8 = vadd.f32 %v2464_v3, %v3392_v38  ;;  %v2467_v9 = vadd.f32 %v2466_v6, %v2465_v4  ;;  %v2528_v12 = vadd.f32 %v2527_v11, %v2526_v5  ;;  %v2529_v13 = vpop.f32.mrb[22].mxu1 }
 0x12e   : > { %v2530_v15 = vpop.f32.mrb[23].mxu1 }
 0x12f   : > { %v844_v14 = vadd.f32 %v2467_v9, %v3392_v38  ;;  %v3444_v16 = vadd.f32 %v2528_v12, %v841_v8  ;;  %v2531_v17 = vadd.f32 %v2530_v15, %v2529_v13 }
 0x131   : > { %v2468_v18 = vpop.f32.mrb[24].mxu0  ;;  %v3446_v19 = vadd.f32 %v2531_v17, %v844_v14 }
 0x132   : > { %v2469_v20 = vpop.f32.mrb[25].mxu0 }
 0x133   : > { %v2470_v21 = vadd.f32 %v2469_v20, %v2468_v18  ;;  %v2471_v22 = vpop.f32.mrb[26].mxu0  ;;  %v2532_v23 = vpop.f32.mrb[24].mxu1 }
 0x134   : > { %v2472_v24 = vpop.f32.mrb[27].mxu0  ;;  %v2533_v29 = vpop.f32.mrb[25].mxu1 }
 0x135   : > { %v849_v26 = vadd.f32 %v2470_v21, %v3392_v38  ;;  %v2473_v27 = vadd.f32 %v2472_v24, %v2471_v22  ;;  %v2534_v30 = vadd.f32 %v2533_v29, %v2532_v23  ;;  %v2535_v31 = vpop.f32.mrb[26].mxu1 }
 0x136   : > { %v2536_v33 = vpop.f32.mrb[27].mxu1 }
 0x137   : > { %v852_v32 = vadd.f32 %v2473_v27, %v3392_v38  ;;  %v3450_v35 = vadd.f32 %v2534_v30, %v849_v26  ;;  %v2537_v37 = vadd.f32 %v2536_v33, %v2535_v31 }
 0x139   : > { %v2474_v39 = vpop.f32.mrb[28].mxu0  ;;  %v3452_v40 = vadd.f32 %v2537_v37, %v852_v32 }
 0x13a   : > { %v2475_v41 = vpop.f32.mrb[29].mxu0 }
 0x13b   : > { %v2476_v42 = vadd.f32 %v2475_v41, %v2474_v39  ;;  %v2477_v43 = vpop.f32.mrb[30].mxu0  ;;  %v2538_v45 = vpop.f32.mrb[28].mxu1 }
 0x13c   : > { %v2478_v46 = vpop.f32.mrb[31].mxu0  ;;  %v2539_v50 = vpop.f32.mrb[29].mxu1 }
 0x13d   : > { %v857_v48 = vadd.f32 %v2476_v42, %v3392_v38  ;;  %v2479_v49 = vadd.f32 %v2478_v46, %v2477_v43  ;;  %v2540_v51 = vadd.f32 %v2539_v50, %v2538_v45  ;;  %v2541_v52 = vpop.f32.mrb[30].mxu1 }
 0x13e   : > { %v2542_v55 = vpop.f32.mrb[31].mxu1 }
 0x13f   : > { %v860_v54 = vadd.f32 %v2479_v49, %v3392_v38  ;;  %v3456_v57 = vadd.f32 %v2540_v51, %v857_v48  ;;  %v2543_v58 = vadd.f32 %v2542_v55, %v2541_v52 }
 0x141   : > { %v2560_v59 = vpop.f32.mrb[32].mxu0  ;;  %v3458_v60 = vadd.f32 %v2543_v58, %v860_v54 }
 0x142   : > { %v2561_v61 = vpop.f32.mrb[33].mxu0 }
 0x143   : > { %v2562_v63 = vadd.f32 %v2561_v61, %v2560_v59  ;;  %v2563_v0 = vpop.f32.mrb[34].mxu0  ;;  %v2687_v3 = vpop.f32.mrb[32].mxu1 }
 0x144   : > { %v2564_v2 = vpop.f32.mrb[35].mxu0  ;;  %v1091_v6 = vpop.f32.mrb[33].mxu1 }
 0x145   : > { %v2565_v4 = vadd.f32 %v2564_v2, %v2563_v0  ;;  %v995_v5 = vadd.f32 %v2562_v63, %v3402_v53  ;;  %v2688_v8 = vpop.f32.mrb[34].mxu1 }
 0x146   : > { %v1094_v11 = vpop.f32.mrb[35].mxu1 }
 0x147   : > { %v1092_v9 = vadd.f32 %v1091_v6, %v995_v5  ;;  %v998_v38 = vadd.f32 %v2565_v4, %v3404_v56 }
 0x149   : > { %v1095_v12 = vadd.f32 %v1094_v11, %v998_v38  ;;  %v2566_v13 = vpop.f32.mrb[36].mxu0  ;;  %v1154_v15 = vmax.f32 %v1092_v9, 0.0 }
 0x14a   : > { %v2567_v14 = vpop.f32.mrb[37].mxu0 }
 0x14b   : > { %v1155_v17 = vmax.f32 %v1095_v12, 0.0  ;;  %v2568_v18 = vadd.f32 %v2567_v14, %v2566_v13  ;;  %v2569_v20 = vpop.f32.mrb[38].mxu0  ;;  %v2691_v22 = vpop.f32.mrb[36].mxu1 }
 0x14c   : > { %v2570_v21 = vpop.f32.mrb[39].mxu0  ;;  %v1107_v53 = vpop.f32.mrb[37].mxu1 }
 0x14d   : > { %v1170_v23 = vpack.c.bf16 %v1155_v17, %v1154_v15  ;;  %v1003_v24 = vadd.f32 %v2568_v18, %v3414_v7  ;;  %v2571_v26 = vadd.f32 %v2570_v21, %v2569_v20  ;;  %v2692_v27 = vpop.f32.mrb[38].mxu1 }
 0x14e   : > { %v1110_v56 = vpop.f32.mrb[39].mxu1 }
 0x14f   : > { %v1100_v29 = vadd.f32 %v2687_v3, %v1003_v24  ;;  %v1006_v30 = vadd.f32 %v2571_v26, %v3416_v10  ;;  %2717 = vmatprep.mubr.bf16.mxu1 %v1170_v23 }
 0x151   : > { %v1103_v31 = vadd.f32 %v2688_v8, %v1006_v30  ;;  %v2572_v32 = vpop.f32.mrb[40].mxu0  ;;  %v1156_v37 = vmax.f32 %v1100_v29, 0.0 }
 0x152   : > { %v2573_v33 = vpop.f32.mrb[41].mxu0 }
 0x153   : > { %v1157_v39 = vmax.f32 %v1103_v31, 0.0  ;;  %v2574_v41 = vadd.f32 %v2573_v33, %v2572_v32  ;;  %v2575_v42 = vpop.f32.mrb[42].mxu0  ;;  %v2695_v45 = vpop.f32.mrb[40].mxu1 }
 0x154   : > { %v2576_v43 = vpop.f32.mrb[43].mxu0  ;;  %v1123_v49 = vpop.f32.mrb[41].mxu1 }
 0x155   : > { %v1171_v46 = vpack.c.bf16 %v1157_v39, %v1156_v37  ;;  %v2577_v48 = vadd.f32 %v2576_v43, %v2575_v42  ;;  %v1011_v7 = vadd.f32 %v2574_v41, %v3426_v25  ;;  %v2696_v50 = vpop.f32.mrb[42].mxu1 }
 0x156   : > { %v1126_v52 = vpop.f32.mrb[43].mxu1 }
 0x157   : > { %v1108_v51 = vadd.f32 %v1107_v53, %v1011_v7  ;;  %2718 = vmatmul.mubr.bf16.vlgmr.msra.gmra.mrb[48].mxu1 %v1171_v46  ;;  %v1014_v10 = vadd.f32 %v2577_v48, %v3428_v28 }
 0x159   : > { %v1111_v54 = vadd.f32 %v1110_v56, %v1014_v10  ;;  %v2578_v55 = vpop.f32.mrb[44].mxu0  ;;  %v1158_v59 = vmax.f32 %v1108_v51, 0.0 }
 0x15a   : > { %v2579_v58 = vpop.f32.mrb[45].mxu0 }
 0x15b   : > { %v1159_v61 = vmax.f32 %v1111_v54, 0.0  ;;  %v2580_v63 = vadd.f32 %v2579_v58, %v2578_v55  ;;  %v2581_v0 = vpop.f32.mrb[46].mxu0  ;;  %v3466_v3 = vpop.f32.mrb[44].mxu1 }
 0x15c   : > { %v2582_v2 = vpop.f32.mrb[47].mxu0  ;;  %v1139_v6 = vpop.f32.mrb[45].mxu1 }
 0x15d   : > { %v1172_v4 = vpack.c.bf16 %v1159_v61, %v1158_v59  ;;  %v1019_v25 = vadd.f32 %v2580_v63, %v3432_v44  ;;  %v2583_v5 = vadd.f32 %v2582_v2, %v2581_v0  ;;  %v2700_v8 = vpop.f32.mrb[46].mxu1 }
 0x15e   : > { %v1142_v38 = vpop.f32.mrb[47].mxu1 }
 0x15f   : > { %v1116_v9 = vadd.f32 %v2691_v22, %v1019_v25  ;;  %v1022_v28 = vadd.f32 %v2583_v5, %v3434_v47  ;;  %2721 = vmatprep.mubr.bf16.mxu1 %v1172_v4 }
 0x161   : > { %v1119_v11 = vadd.f32 %v2692_v27, %v1022_v28  ;;  %v2584_v12 = vpop.f32.mrb[48].mxu0  ;;  %v1160_v14 = vmax.f32 %v1116_v9, 0.0  ;;  %v2938_v28 = vld [vmem:[%s3620_s1 + $0x1f8] sm:$0xff]  }
 0x162   : > { %v2585_v13 = vpop.f32.mrb[49].mxu0  ;;  %2745 = vmatprep.subr.bf16.mxu0 %v2938_v28 }
 0x163   : > { %v1161_v15 = vmax.f32 %v1119_v11, 0.0  ;;  %v2586_v17 = vadd.f32 %v2585_v13, %v2584_v12  ;;  %v2587_v18 = vpop.f32.mrb[50].mxu0  ;;  %2746 = vmatpush3.bf16.msra.mxu0 %v2938_v28  ;;  %v2942_v28 = vld [vmem:[%s3620_s1 + $0x218] sm:$0xff]  }
 0x164   : > { %v2588_v20 = vpop.f32.mrb[51].mxu0 }
 0x165   : > { %v2589_v21 = vadd.f32 %v2588_v20, %v2587_v18  ;;  %v1027_v23 = vadd.f32 %v2586_v17, %v3438_v62  ;;  %v1173_v44 = vpack.c.bf16 %v1161_v15, %v1160_v14 }
 0x167   : > { %v1124_v24 = vadd.f32 %v1123_v49, %v1027_v23  ;;  %2722 = vmatmul.mubr.bf16.gmra.mrb[52].mxu1 %v1173_v44  ;;  %v1030_v22 = vadd.f32 %v2589_v21, %v3440_v1 }
 0x169   : > { %v1127_v26 = vadd.f32 %v1126_v52, %v1030_v22  ;;  %v2590_v47 = vpop.f32.mrb[52].mxu0  ;;  %v1162_v29 = vmax.f32 %v1124_v24, 0.0 }
 0x16a   : > { %v2591_v53 = vpop.f32.mrb[53].mxu0 }
 0x16b   : > { %v1163_v27 = vmax.f32 %v1127_v26, 0.0  ;;  %v2592_v30 = vadd.f32 %v2591_v53, %v2590_v47  ;;  %v2593_v56 = vpop.f32.mrb[54].mxu0 }
 0x16c   : > { %v2594_v31 = vpop.f32.mrb[55].mxu0 }
 0x16d   : > { %v1174_v32 = vpack.c.bf16 %v1163_v27, %v1162_v29  ;;  %v1035_v33 = vadd.f32 %v2592_v30, %v3444_v16  ;;  %v2595_v37 = vadd.f32 %v2594_v31, %v2593_v56 }
 0x16f   : > { %v1132_v39 = vadd.f32 %v2695_v45, %v1035_v33  ;;  %v1038_v62 = vadd.f32 %v2595_v37, %v3446_v19  ;;  %2725 = vmatprep.mubr.bf16.mxu1 %v1174_v32 }
 0x171   : > { %v1135_v41 = vadd.f32 %v2696_v50, %v1038_v62  ;;  %v2596_v42 = vpop.f32.mrb[56].mxu0  ;;  %v1164_v1 = vmax.f32 %v1132_v39, 0.0 }
 0x172   : > { %v2597_v43 = vpop.f32.mrb[57].mxu0 }
 0x173   : > { %v1165_v46 = vmax.f32 %v1135_v41, 0.0  ;;  %v2598_v48 = vadd.f32 %v2597_v43, %v2596_v42  ;;  %v2599_v7 = vpop.f32.mrb[58].mxu0 }
 0x174   : > { %v2600_v49 = vpop.f32.mrb[59].mxu0 }
 0x175   : > { %v2601_v51 = vadd.f32 %v2600_v49, %v2599_v7  ;;  %v1043_v10 = vadd.f32 %v2598_v48, %v3450_v35  ;;  %v1175_v52 = vpack.c.bf16 %v1165_v46, %v1164_v1 }
 0x177   : > { %v1140_v54 = vadd.f32 %v1139_v6, %v1043_v10  ;;  %2726 = vmatmul.mubr.bf16.gmra.mrb[56].mxu1 %v1175_v52  ;;  %v1046_v16 = vadd.f32 %v2601_v51, %v3452_v40 }
 0x179   : > { %v1143_v45 = vadd.f32 %v1142_v38, %v1046_v16  ;;  %v2602_v55 = vpop.f32.mrb[60].mxu0  ;;  %v1166_v58 = vmax.f32 %v1140_v54, 0.0 }
 0x17a   : > { %v2603_v19 = vpop.f32.mrb[61].mxu0 }
 0x17b   : > { %v1167_v50 = vmax.f32 %v1143_v45, 0.0  ;;  %v2604_v59 = vadd.f32 %v2603_v19, %v2602_v55  ;;  %v2605_v61 = vpop.f32.mrb[62].mxu0 }
 0x17c   : > { %v2606_v63 = vpop.f32.mrb[63].mxu0 }
 0x17d   : > { %v1176_v0 = vpack.c.bf16 %v1167_v50, %v1166_v58  ;;  %v1051_v2 = vadd.f32 %v2604_v59, %v3456_v57  ;;  %v2607_v4 = vadd.f32 %v2606_v63, %v2605_v61  ;;  %v2939_v57 = vld [vmem:[%s3620_s1 + $0x200] sm:$0xff]  }
 0x17e   : > { %2747 = vmatprep.subr.bf16.mxu0 %v2939_v57 }
 0x17f   : > { %v1148_v25 = vadd.f32 %v3466_v3, %v1051_v2  ;;  %v1054_v35 = vadd.f32 %v2607_v4, %v3458_v60  ;;  %2729 = vmatprep.mubr.bf16.mxu1 %v1176_v0  ;;  %2748 = vmatpush3.bf16.msra.mxu0 %v2939_v57  ;;  %v2940_v60 = vld [vmem:[%s3620_s1 + $0x208] sm:$0xff]   ;;  %v2941_v3 = vld [vmem:[%s3620_s1 + $0x210] sm:$0xff]   ;;  %v2943_v57 = vld [vmem:[%s3620_s1 + $0x220] sm:$0xff]  }
 0x180   : > { %2765 = vmatprep.subr.bf16.mxu1 %v2940_v60 }
 0x181   : > { %v1151_v5 = vadd.f32 %v2700_v8, %v1054_v35  ;;  %v1168_v6 = vmax.f32 %v1148_v25, 0.0  ;;  %2766 = vmatpush3.bf16.msra.mxu1 %v2940_v60  ;;  %v1196_v8 = vsub.s32 1, %v3383_v34  ;;  %v2944_v60 = vld [vmem:[%s3620_s1 + $0x228] sm:$0xff]  }
 0x182   : > { %2767 = vmatprep.subr.bf16.mxu1 %v2941_v3  ;;  %2789 = vmatprep.subr.bf16.mxu0 %v2944_v60 }
 0x183   : > { %v1169_v40 = vmax.f32 %v1151_v5, 0.0  ;;  %v1197_v38 = vrot.slane %v3389_v36, %v1196_v8  ;;  %v1385_v8 = vsub.s32 2, %v3383_v34 }
 0x185   : > { %v1177_v9 = vpack.c.bf16 %v1169_v40, %v1168_v6  ;;  %2768 = vmatpush3.bf16.msra.mxu1 %v2941_v3  ;;  %v2945_v3 = vld [vmem:[%s3620_s1 + $0x230] sm:$0xff]  }
 0x186   : > { %2769 = vmatprep.subr.bf16.mxu1 %v2942_v28 }
 0x187   : > { %2730 = vmatmul.mubr.bf16.gmra.mrb[60].mxu1 %v1177_v9 }
 0x189   : > { %2770 = vmatpush3.bf16.msra.mxu1 %v2942_v28  ;;  %v2946_v28 = vld [vmem:[%s3620_s1 + $0x238] sm:$0xff]  }
 0x18a   : > { %2771 = vmatprep.subr.bf16.mxu1 %v2943_v57 }
 0x18d   : > { %2772 = vmatpush3.bf16.msra.mxu1 %v2943_v57  ;;  %v2947_v57 = vld [vmem:[%s3620_s1 + $0x240] sm:$0xff]  }
 0x22a   : > { %v2719_v11 = vpop.f32.mrb[48].mxu1 }
 0x22b   : > { %v1289_v12 = vadd.f32 %v2719_v11, %v1197_v38  ;;  %v1280_v13 = vpop.f32.mrb[49].mxu1 }
 0x22c   : > { %v1281_v14 = vadd.f32 %v1280_v13, %v1197_v38  ;;  %v2720_v15 = vpop.f32.mrb[50].mxu1 }
 0x22d   : > { %v1292_v17 = vadd.f32 %v2720_v15, %v1197_v38  ;;  %v1283_v18 = vpop.f32.mrb[51].mxu1  ;;  %v1345_v21 = vmax.f32 %v1289_v12, 0.0 }
 0x22e   : > { %v1284_v20 = vadd.f32 %v1283_v18, %v1197_v38  ;;  %v1343_v44 = vmax.f32 %v1281_v14, 0.0 }
 0x22f   : > { %v1346_v23 = vmax.f32 %v1292_v17, 0.0 }
 0x230   : > { %v1344_v24 = vmax.f32 %v1284_v20, 0.0 }
 0x231   : > { %v1360_v22 = vpack.c.bf16 %v1346_v23, %v1345_v21 }
 0x232   : > { %v1359_v26 = vpack.c.bf16 %v1344_v24, %v1343_v44 }
 0x234   : > { %2749 = vmatprep.mubr.bf16.mxu0 %v1359_v26 }
 0x235   : > { %2750 = vmatmul.mubr.bf16.vlgmr.msra.gmra.mrb[64].mxu0 %v1360_v22 }
 0x236   : > { %2790 = vmatpush3.bf16.msra.mxu0 %v2944_v60  ;;  %v1566_v60 = vsub.s32 3, %v3383_v34 }
 0x237   : > { %2791 = vmatprep.subr.bf16.mxu0 %v2945_v3 }
 0x23a   : > { %v2723_v47 = vpop.f32.mrb[52].mxu1  ;;  %2792 = vmatpush3.bf16.msra.mxu0 %v2945_v3  ;;  %v1567_v3 = vrot.slane %v3389_v36, %v1566_v60 }
 0x23b   : > { %v1305_v53 = vadd.f32 %v2723_v47, %v1197_v38  ;;  %v1296_v29 = vpop.f32.mrb[53].mxu1  ;;  %2793 = vmatprep.subr.bf16.mxu0 %v2946_v28 }
 0x23c   : > { %v1297_v27 = vadd.f32 %v1296_v29, %v1197_v38  ;;  %v2724_v30 = vpop.f32.mrb[54].mxu1 }
 0x23d   : > { %v1308_v56 = vadd.f32 %v2724_v30, %v1197_v38  ;;  %v1299_v31 = vpop.f32.mrb[55].mxu1  ;;  %v1349_v33 = vmax.f32 %v1305_v53, 0.0 }
 0x23e   : > { %v1300_v32 = vadd.f32 %v1299_v31, %v1197_v38  ;;  %v1347_v39 = vmax.f32 %v1297_v27, 0.0  ;;  %2794 = vmatpush3.bf16.msra.mxu0 %v2946_v28  ;;  %v3541_v28 = vld [vmem:[%s3621_s2] sm:$0xff] }
 0x23f   : > { %v1350_v37 = vmax.f32 %v1308_v56, 0.0  ;;  %2795 = vmatprep.subr.bf16.mxu0 %v2947_v57 }
 0x240   : > { %v1348_v62 = vmax.f32 %v1300_v32, 0.0 }
 0x241   : > { %v1362_v41 = vpack.c.bf16 %v1350_v37, %v1349_v33 }
 0x242   : > { %v1361_v42 = vpack.c.bf16 %v1348_v62, %v1347_v39  ;;  %2796 = vmatpush3.bf16.msra.mxu0 %v2947_v57 }
 0x244   : > { %2753 = vmatprep.mubr.bf16.mxu0 %v1361_v42 }
 0x245   : > { %2754 = vmatmul.mubr.bf16.gmra.mrb[68].mxu0 %v1362_v41 }
 0x24a   : > { %v2727_v43 = vpop.f32.mrb[56].mxu1 }
 0x24b   : > { %v1321_v1 = vadd.f32 %v2727_v43, %v1197_v38  ;;  %v1312_v46 = vpop.f32.mrb[57].mxu1 }
 0x24c   : > { %v1313_v48 = vadd.f32 %v1312_v46, %v1197_v38  ;;  %v2728_v7 = vpop.f32.mrb[58].mxu1 }
 0x24d   : > { %v1324_v49 = vadd.f32 %v2728_v7, %v1197_v38  ;;  %v1315_v51 = vpop.f32.mrb[59].mxu1  ;;  %v1353_v52 = vmax.f32 %v1321_v1, 0.0 }
 0x24e   : > { %v1316_v10 = vadd.f32 %v1315_v51, %v1197_v38  ;;  %v1351_v16 = vmax.f32 %v1313_v48, 0.0 }
 0x24f   : > { %v1354_v54 = vmax.f32 %v1324_v49, 0.0 }
 0x250   : > { %v1352_v45 = vmax.f32 %v1316_v10, 0.0 }
 0x251   : > { %v1364_v55 = vpack.c.bf16 %v1354_v54, %v1353_v52 }
 0x252   : > { %v1363_v19 = vpack.c.bf16 %v1352_v45, %v1351_v16 }
 0x254   : > { %2757 = vmatprep.mubr.bf16.mxu0 %v1363_v19 }
 0x255   : > { %2758 = vmatmul.mubr.bf16.gmra.mrb[72].mxu0 %v1364_v55 }
 0x25a   : > { %v2731_v58 = vpop.f32.mrb[60].mxu1 }
 0x25b   : > { %v1337_v50 = vadd.f32 %v2731_v58, %v1197_v38  ;;  %v1328_v59 = vpop.f32.mrb[61].mxu1 }
 0x25c   : > { %v1329_v61 = vadd.f32 %v1328_v59, %v1197_v38  ;;  %v2732_v63 = vpop.f32.mrb[62].mxu1 }
 0x25d   : > { %v1340_v0 = vadd.f32 %v2732_v63, %v1197_v38  ;;  %v1331_v2 = vpop.f32.mrb[63].mxu1  ;;  %v1357_v25 = vmax.f32 %v1337_v50, 0.0 }
 0x25e   : > { %v1332_v4 = vadd.f32 %v1331_v2, %v1197_v38  ;;  %v1355_v5 = vmax.f32 %v1329_v61, 0.0  ;;  %v1386_v38 = vrot.slane %v3389_v36, %v1385_v8 }
 0x25f   : > { %v1358_v35 = vmax.f32 %v1340_v0, 0.0 }
 0x260   : > { %v1356_v6 = vmax.f32 %v1332_v4, 0.0 }
 0x261   : > { %v1366_v40 = vpack.c.bf16 %v1358_v35, %v1357_v25 }
 0x262   : > { %v1365_v9 = vpack.c.bf16 %v1356_v6, %v1355_v5 }
 0x264   : > { %2761 = vmatprep.mubr.bf16.mxu0 %v1365_v9 }
 0x265   : > { %2762 = vmatmul.mubr.bf16.gmra.mrb[76].mxu0 %v1366_v40 }
 0x308   : > { %v2751_v11 = vpop.f32.mrb[64].mxu0 }
 0x309   : > { %v1478_v12 = vadd.f32 %v2751_v11, %v1386_v38  ;;  %v1469_v13 = vpop.f32.mrb[65].mxu0 }
 0x30a   : > { %v1470_v14 = vadd.f32 %v1469_v13, %v1386_v38  ;;  %v2752_v15 = vpop.f32.mrb[66].mxu0 }
 0x30b   : > { %v1481_v17 = vadd.f32 %v2752_v15, %v1386_v38  ;;  %v1472_v18 = vpop.f32.mrb[67].mxu0  ;;  %v1534_v21 = vmax.f32 %v1478_v12, 0.0 }
 0x30c   : > { %v1473_v20 = vadd.f32 %v1472_v18, %v1386_v38  ;;  %v1532_v44 = vmax.f32 %v1470_v14, 0.0 }
 0x30d   : > { %v1535_v23 = vmax.f32 %v1481_v17, 0.0 }
 0x30e   : > { %v1533_v24 = vmax.f32 %v1473_v20, 0.0 }
 0x30f   : > { %v1549_v22 = vpack.c.bf16 %v1535_v23, %v1534_v21 }
 0x310   : > { %v1548_v26 = vpack.c.bf16 %v1533_v24, %v1532_v44 }
 0x312   : > { %2773 = vmatprep.mubr.msk.bf16.mxu1 %vm1592_vm1, %v1548_v26 }
 0x313   : > { %2774 = vmatmul.mubr.msk.bf16.vlgmr.msra.gmra.mrb[64].mxu1 %vm1592_vm1, %v1549_v22 }
 0x318   : > { %v2755_v47 = vpop.f32.mrb[68].mxu0 }
 0x319   : > { %v1494_v53 = vadd.f32 %v2755_v47, %v1386_v38  ;;  %v1485_v29 = vpop.f32.mrb[69].mxu0 }
 0x31a   : > { %v1486_v27 = vadd.f32 %v1485_v29, %v1386_v38  ;;  %v2756_v30 = vpop.f32.mrb[70].mxu0 }
 0x31b   : > { %v1497_v56 = vadd.f32 %v2756_v30, %v1386_v38  ;;  %v1488_v31 = vpop.f32.mrb[71].mxu0  ;;  %v1538_v33 = vmax.f32 %v1494_v53, 0.0 }
 0x31c   : > { %v1489_v32 = vadd.f32 %v1488_v31, %v1386_v38  ;;  %v1536_v39 = vmax.f32 %v1486_v27, 0.0 }
 0x31d   : > { %v1539_v37 = vmax.f32 %v1497_v56, 0.0 }
 0x31e   : > { %v1537_v62 = vmax.f32 %v1489_v32, 0.0 }
 0x31f   : > { %v1551_v41 = vpack.c.bf16 %v1539_v37, %v1538_v33 }
 0x320   : > { %v1550_v42 = vpack.c.bf16 %v1537_v62, %v1536_v39 }
 0x322   : > { %2777 = vmatprep.mubr.msk.bf16.mxu1 %vm1592_vm1, %v1550_v42 }
 0x323   : > { %2778 = vmatmul.mubr.msk.bf16.gmra.mrb[68].mxu1 %vm1592_vm1, %v1551_v41 }
 0x328   : > { %v2759_v43 = vpop.f32.mrb[72].mxu0 }
 0x329   : > { %v1510_v1 = vadd.f32 %v2759_v43, %v1386_v38  ;;  %v1501_v46 = vpop.f32.mrb[73].mxu0 }
 0x32a   : > { %v1502_v48 = vadd.f32 %v1501_v46, %v1386_v38  ;;  %v2760_v7 = vpop.f32.mrb[74].mxu0 }
 0x32b   : > { %v1513_v49 = vadd.f32 %v2760_v7, %v1386_v38  ;;  %v1504_v51 = vpop.f32.mrb[75].mxu0  ;;  %v1542_v52 = vmax.f32 %v1510_v1, 0.0 }
 0x32c   : > { %v1505_v10 = vadd.f32 %v1504_v51, %v1386_v38  ;;  %v1540_v16 = vmax.f32 %v1502_v48, 0.0 }
 0x32d   : > { %v1543_v54 = vmax.f32 %v1513_v49, 0.0 }
 0x32e   : > { %v1541_v45 = vmax.f32 %v1505_v10, 0.0 }
 0x32f   : > { %v1553_v55 = vpack.c.bf16 %v1543_v54, %v1542_v52 }
 0x330   : > { %v1552_v19 = vpack.c.bf16 %v1541_v45, %v1540_v16 }
 0x332   : > { %2781 = vmatprep.mubr.msk.bf16.mxu1 %vm1592_vm1, %v1552_v19 }
 0x333   : > { %2782 = vmatmul.mubr.msk.bf16.gmra.mrb[72].mxu1 %vm1592_vm1, %v1553_v55 }
 0x338   : > { %v2763_v58 = vpop.f32.mrb[76].mxu0 }
 0x339   : > { %v1526_v50 = vadd.f32 %v2763_v58, %v1386_v38  ;;  %v1517_v59 = vpop.f32.mrb[77].mxu0 }
 0x33a   : > { %v1518_v61 = vadd.f32 %v1517_v59, %v1386_v38  ;;  %v2764_v63 = vpop.f32.mrb[78].mxu0 }
 0x33b   : > { %v1529_v0 = vadd.f32 %v2764_v63, %v1386_v38  ;;  %v1520_v2 = vpop.f32.mrb[79].mxu0  ;;  %v1546_v25 = vmax.f32 %v1526_v50, 0.0 }
 0x33c   : > { %v1521_v4 = vadd.f32 %v1520_v2, %v1386_v38  ;;  %v1544_v5 = vmax.f32 %v1518_v61, 0.0 }
 0x33d   : > { %v1547_v35 = vmax.f32 %v1529_v0, 0.0 }
 0x33e   : > { %v1545_v6 = vmax.f32 %v1521_v4, 0.0 }
 0x33f   : > { %v1555_v40 = vpack.c.bf16 %v1547_v35, %v1546_v25 }
 0x340   : > { %v1554_v9 = vpack.c.bf16 %v1545_v6, %v1544_v5  ;;  %v2948_v6 = vld [vmem:[%s3620_s1 + $0x248] sm:$0xff]  }
 0x341   : > { %2813 = vmatprep.subr.bf16.mxu1 %v2948_v6 }
 0x342   : > { %2785 = vmatprep.mubr.msk.bf16.mxu1 %vm1592_vm1, %v1554_v9  ;;  %2814 = vmatpush3.bf16.msra.mxu1 %v2948_v6  ;;  %v1748_v9 = vsub.s32 4, %v3383_v34 }
 0x343   : > { %2786 = vmatmul.mubr.msk.bf16.gmra.mrb[76].mxu1 %vm1592_vm1, %v1555_v40  ;;  %v2949_v40 = vld [vmem:[%s3620_s1 + $0x250] sm:$0xff]  }
 0x344   : > { %2815 = vmatprep.subr.bf16.mxu1 %v2949_v40  ;;  %v1749_v57 = vrot.slane %v3541_v28, %v1748_v9 }
 0x346   : > { %2816 = vmatpush3.bf16.msra.mxu1 %v2949_v40 }
 0x3e6   : > { %v2775_v8 = vpop.f32.mrb[64].mxu1 }
 0x3e7   : > { %v1660_v38 = vadd.f32 %v2775_v8, %v1567_v3  ;;  %v1651_v11 = vpop.f32.mrb[65].mxu1 }
 0x3e8   : > { %v1652_v12 = vadd.f32 %v1651_v11, %v1567_v3  ;;  %v2776_v13 = vpop.f32.mrb[66].mxu1 }
 0x3e9   : > { %v1663_v14 = vadd.f32 %v2776_v13, %v1567_v3  ;;  %v1654_v15 = vpop.f32.mrb[67].mxu1  ;;  %v1716_v18 = vmax.f32 %v1660_v38, 0.0 }
 0x3ea   : > { %v1655_v17 = vadd.f32 %v1654_v15, %v1567_v3  ;;  %v1714_v21 = vmax.f32 %v1652_v12, 0.0 }
 0x3eb   : > { %v1717_v20 = vmax.f32 %v1663_v14, 0.0 }
 0x3ec   : > { %v1715_v23 = vmax.f32 %v1655_v17, 0.0 }
 0x3ed   : > { %v1731_v44 = vpack.c.bf16 %v1717_v20, %v1716_v18 }
 0x3ee   : > { %v1730_v24 = vpack.c.bf16 %v1715_v23, %v1714_v21 }
 0x3f0   : > { %2797 = vmatprep.mubr.msk.bf16.mxu0 %vm1592_vm1, %v1730_v24 }
 0x3f1   : > { %2798 = vmatmul.mubr.msk.bf16.vlgmr.msra.gmra.mrb[80].mxu0 %vm1592_vm1, %v1731_v44 }
 0x3f6   : > { %v2779_v22 = vpop.f32.mrb[68].mxu1 }
 0x3f7   : > { %v1676_v36 = vadd.f32 %v2779_v22, %v1567_v3  ;;  %v1667_v26 = vpop.f32.mrb[69].mxu1 }
 0x3f8   : > { %v1668_v47 = vadd.f32 %v1667_v26, %v1567_v3  ;;  %v2780_v53 = vpop.f32.mrb[70].mxu1 }
 0x3f9   : > { %v1679_v29 = vadd.f32 %v2780_v53, %v1567_v3  ;;  %v1670_v27 = vpop.f32.mrb[71].mxu1  ;;  %v1720_v56 = vmax.f32 %v1676_v36, 0.0 }
 0x3fa   : > { %v1671_v30 = vadd.f32 %v1670_v27, %v1567_v3  ;;  %v1718_v32 = vmax.f32 %v1668_v47, 0.0 }
 0x3fb   : > { %v1721_v31 = vmax.f32 %v1679_v29, 0.0 }
 0x3fc   : > { %v1719_v33 = vmax.f32 %v1671_v30, 0.0 }
 0x3fd   : > { %v1733_v37 = vpack.c.bf16 %v1721_v31, %v1720_v56 }
 0x3fe   : > { %v1732_v39 = vpack.c.bf16 %v1719_v33, %v1718_v32 }
 0x400   : > { %2801 = vmatprep.mubr.msk.bf16.mxu0 %vm1592_vm1, %v1732_v39 }
 0x401   : > { %2802 = vmatmul.mubr.msk.bf16.gmra.mrb[84].mxu0 %vm1592_vm1, %v1733_v37 }
 0x406   : > { %v2783_v62 = vpop.f32.mrb[72].mxu1 }
 0x407   : > { %v1692_v41 = vadd.f32 %v2783_v62, %v1567_v3  ;;  %v1683_v42 = vpop.f32.mrb[73].mxu1 }
 0x408   : > { %v1684_v43 = vadd.f32 %v1683_v42, %v1567_v3  ;;  %v2784_v1 = vpop.f32.mrb[74].mxu1 }
 0x409   : > { %v1695_v46 = vadd.f32 %v2784_v1, %v1567_v3  ;;  %v1686_v48 = vpop.f32.mrb[75].mxu1  ;;  %v1724_v49 = vmax.f32 %v1692_v41, 0.0 }
 0x40a   : > { %v1687_v7 = vadd.f32 %v1686_v48, %v1567_v3  ;;  %v1722_v10 = vmax.f32 %v1684_v43, 0.0 }
 0x40b   : > { %v1725_v51 = vmax.f32 %v1695_v46, 0.0 }
 0x40c   : > { %v1723_v52 = vmax.f32 %v1687_v7, 0.0 }
 0x40d   : > { %v1735_v54 = vpack.c.bf16 %v1725_v51, %v1724_v49 }
 0x40e   : > { %v1734_v16 = vpack.c.bf16 %v1723_v52, %v1722_v10 }
 0x410   : > { %2805 = vmatprep.mubr.msk.bf16.mxu0 %vm1592_vm1, %v1734_v16 }
 0x411   : > { %2806 = vmatmul.mubr.msk.bf16.gmra.mrb[88].mxu0 %vm1592_vm1, %v1735_v54 }
 0x416   : > { %v2787_v45 = vpop.f32.mrb[76].mxu1 }
 0x417   : > { %v1708_v55 = vadd.f32 %v2787_v45, %v1567_v3  ;;  %v1699_v19 = vpop.f32.mrb[77].mxu1 }
 0x418   : > { %v1700_v58 = vadd.f32 %v1699_v19, %v1567_v3  ;;  %v2788_v50 = vpop.f32.mrb[78].mxu1 }
 0x419   : > { %v1711_v59 = vadd.f32 %v2788_v50, %v1567_v3  ;;  %v1702_v61 = vpop.f32.mrb[79].mxu1  ;;  %v1728_v0 = vmax.f32 %v1708_v55, 0.0 }
 0x41a   : > { %v1703_v63 = vadd.f32 %v1702_v61, %v1567_v3  ;;  %v1726_v4 = vmax.f32 %v1700_v58, 0.0 }
 0x41b   : > { %v1729_v2 = vmax.f32 %v1711_v59, 0.0 }
 0x41c   : > { %v1727_v25 = vmax.f32 %v1703_v63, 0.0 }
 0x41d   : > { %v1737_v35 = vpack.c.bf16 %v1729_v2, %v1728_v0 }
 0x41e   : > { %v1736_v5 = vpack.c.bf16 %v1727_v25, %v1726_v4 }
 0x420   : > { %2809 = vmatprep.mubr.msk.bf16.mxu0 %vm1592_vm1, %v1736_v5 }
 0x421   : > { %2810 = vmatmul.mubr.msk.bf16.gmra.mrb[92].mxu0 %vm1592_vm1, %v1737_v35  ;;  %v1925_v35 = vsub.s32 5, %v3383_v34 }
 0x423   : > { %v1926_v5 = vrot.slane %v3541_v28, %v1925_v35 }
 0x4c4   : > { %v2799_v60 = vpop.f32.mrb[80].mxu0 }
 0x4c5   : > { %v1841_v3 = vadd.f32 %v2799_v60, %v1749_v57  ;;  %v1832_v8 = vpop.f32.mrb[81].mxu0 }
 0x4c6   : > { %v1833_v38 = vadd.f32 %v1832_v8, %v1749_v57  ;;  %v2800_v11 = vpop.f32.mrb[82].mxu0 }
 0x4c7   : > { %v1844_v12 = vadd.f32 %v2800_v11, %v1749_v57  ;;  %v1835_v13 = vpop.f32.mrb[83].mxu0  ;;  %v1897_v15 = vmax.f32 %v1841_v3, 0.0 }
 0x4c8   : > { %v1836_v14 = vadd.f32 %v1835_v13, %v1749_v57  ;;  %v1895_v18 = vmax.f32 %v1833_v38, 0.0 }
 0x4c9   : > { %v1898_v17 = vmax.f32 %v1844_v12, 0.0 }
 0x4ca   : > { %v1896_v20 = vmax.f32 %v1836_v14, 0.0 }
 0x4cb   : > { %v1912_v21 = vpack.c.bf16 %v1898_v17, %v1897_v15 }
 0x4cc   : > { %v1911_v23 = vpack.c.bf16 %v1896_v20, %v1895_v18 }
 0x4ce   : > { %2817 = vmatprep.mubr.msk.bf16.mxu1 %vm1939_vm2, %v1911_v23 }
 0x4cf   : > { %2818 = vmatmul.mubr.msk.bf16.vlgmr.msra.gmra.mrb[80].mxu1 %vm1939_vm2, %v1912_v21 }
 0x4d4   : > { %v2803_v44 = vpop.f32.mrb[84].mxu0 }
 0x4d5   : > { %v1857_v24 = vadd.f32 %v2803_v44, %v1749_v57  ;;  %v1848_v22 = vpop.f32.mrb[85].mxu0 }
 0x4d6   : > { %v1849_v36 = vadd.f32 %v1848_v22, %v1749_v57  ;;  %v2804_v26 = vpop.f32.mrb[86].mxu0 }
 0x4d7   : > { %v1860_v47 = vadd.f32 %v2804_v26, %v1749_v57  ;;  %v1851_v53 = vpop.f32.mrb[87].mxu0  ;;  %v1901_v27 = vmax.f32 %v1857_v24, 0.0 }
 0x4d8   : > { %v1852_v29 = vadd.f32 %v1851_v53, %v1749_v57  ;;  %v1899_v56 = vmax.f32 %v1849_v36, 0.0 }
 0x4d9   : > { %v1902_v30 = vmax.f32 %v1860_v47, 0.0 }
 0x4da   : > { %v1900_v31 = vmax.f32 %v1852_v29, 0.0 }
 0x4db   : > { %v1914_v32 = vpack.c.bf16 %v1902_v30, %v1901_v27 }
 0x4dc   : > { %v1913_v33 = vpack.c.bf16 %v1900_v31, %v1899_v56 }
 0x4de   : > { %2821 = vmatprep.mubr.msk.bf16.mxu1 %vm1939_vm2, %v1913_v33 }
 0x4df   : > { %2822 = vmatmul.mubr.msk.bf16.gmra.mrb[84].mxu1 %vm1939_vm2, %v1914_v32 }
 0x4e4   : > { %v2807_v37 = vpop.f32.mrb[88].mxu0 }
 0x4e5   : > { %v1873_v39 = vadd.f32 %v2807_v37, %v1749_v57  ;;  %v1864_v62 = vpop.f32.mrb[89].mxu0 }
 0x4e6   : > { %v1865_v41 = vadd.f32 %v1864_v62, %v1749_v57  ;;  %v2808_v42 = vpop.f32.mrb[90].mxu0 }
 0x4e7   : > { %v1876_v43 = vadd.f32 %v2808_v42, %v1749_v57  ;;  %v1867_v1 = vpop.f32.mrb[91].mxu0  ;;  %v1905_v48 = vmax.f32 %v1873_v39, 0.0 }
 0x4e8   : > { %v1868_v46 = vadd.f32 %v1867_v1, %v1749_v57  ;;  %v1903_v49 = vmax.f32 %v1865_v41, 0.0 }
 0x4e9   : > { %v1906_v7 = vmax.f32 %v1876_v43, 0.0 }
 0x4ea   : > { %v1904_v51 = vmax.f32 %v1868_v46, 0.0 }
 0x4eb   : > { %v1916_v10 = vpack.c.bf16 %v1906_v7, %v1905_v48 }
 0x4ec   : > { %v1915_v52 = vpack.c.bf16 %v1904_v51, %v1903_v49 }
 0x4ee   : > { %2825 = vmatprep.mubr.msk.bf16.mxu1 %vm1939_vm2, %v1915_v52 }
 0x4ef   : > { %2826 = vmatmul.mubr.msk.bf16.gmra.mrb[88].mxu1 %vm1939_vm2, %v1916_v10 }
 0x4f4   : > { %v2811_v54 = vpop.f32.mrb[92].mxu0 }
 0x4f5   : > { %v1889_v16 = vadd.f32 %v2811_v54, %v1749_v57  ;;  %v1880_v45 = vpop.f32.mrb[93].mxu0 }
 0x4f6   : > { %v1881_v55 = vadd.f32 %v1880_v45, %v1749_v57  ;;  %v2812_v19 = vpop.f32.mrb[94].mxu0 }
 0x4f7   : > { %v1892_v58 = vadd.f32 %v2812_v19, %v1749_v57  ;;  %v1883_v50 = vpop.f32.mrb[95].mxu0  ;;  %v1909_v61 = vmax.f32 %v1889_v16, 0.0 }
 0x4f8   : > { %v1884_v59 = vadd.f32 %v1883_v50, %v1749_v57  ;;  %v1907_v0 = vmax.f32 %v1881_v55, 0.0 }
 0x4f9   : > { %v1910_v63 = vmax.f32 %v1892_v58, 0.0 }
 0x4fa   : > { %v1908_v2 = vmax.f32 %v1884_v59, 0.0 }
 0x4fb   : > { %v1918_v4 = vpack.c.bf16 %v1910_v63, %v1909_v61 }
 0x4fc   : > { %v1917_v25 = vpack.c.bf16 %v1908_v2, %v1907_v0 }
 0x4fe   : > { %2829 = vmatprep.mubr.msk.bf16.mxu1 %vm1939_vm2, %v1917_v25 }
 0x4ff   : > { %2830 = vmatmul.mubr.msk.bf16.gmra.mrb[92].mxu1 %vm1939_vm2, %v1918_v4 }
 0x5a2   : > { %v2819_v6 = vpop.f32.mrb[80].mxu1 }
 0x5a3   : > { %v1998_v40 = vpop.f32.mrb[81].mxu1  ;;  %v2007_v57 = vadd.f32 %v2819_v6, %v1926_v5 }
 0x5a4   : > { %v2820_v9 = vpop.f32.mrb[82].mxu1  ;;  %v1999_v8 = vadd.f32 %v1998_v40, %v1926_v5 }
 0x5a5   : > { %v2010_v60 = vadd.f32 %v2820_v9, %v1926_v5  ;;  %v2001_v3 = vpop.f32.mrb[83].mxu1 }
 0x5a6   : > { %v2002_v38 = vadd.f32 %v2001_v3, %v1926_v5 }
 0x5a7   : > { %v2377_v11 = vpack.c.bf16 %v2010_v60, %v2007_v57 }
 0x5a8   : > { %v2372_v12 = vpack.c.bf16 %v2002_v38, %v1999_v8 }
 0x5a9   : > { %2409 = vst [vmem:[%s3557_s26 + $0x8] sm:$0xff] %v2377_v11  }
 0x5aa   : > { %2373 = vst [vmem:[%s3557_s26] sm:$0xff] %v2372_v12  }
 0x5b2   : > { %v2823_v34 = vpop.f32.mrb[84].mxu1 }
 0x5b3   : > { %v2014_v28 = vpop.f32.mrb[85].mxu1  ;;  %v2023_v14 = vadd.f32 %v2823_v34, %v1926_v5 }
 0x5b4   : > { %v2824_v13 = vpop.f32.mrb[86].mxu1  ;;  %v2015_v18 = vadd.f32 %v2014_v28, %v1926_v5 }
 0x5b5   : > { %v2026_v15 = vadd.f32 %v2824_v13, %v1926_v5  ;;  %v2017_v17 = vpop.f32.mrb[87].mxu1 }
 0x5b6   : > { %v2018_v20 = vadd.f32 %v2017_v17, %v1926_v5 }
 0x5b7   : > { %v2387_v21 = vpack.c.bf16 %v2026_v15, %v2023_v14 }
 0x5b8   : > { %v2382_v23 = vpack.c.bf16 %v2018_v20, %v2015_v18 }
 0x5b9   : > { %2411 = vst [vmem:[%s3557_s26 + $0x18] sm:$0xff] %v2387_v21  }
 0x5ba   : > { %2410 = vst [vmem:[%s3557_s26 + $0x10] sm:$0xff] %v2382_v23  }
 0x5c2   : > { %v2827_v44 = vpop.f32.mrb[88].mxu1 }
 0x5c3   : > { %v2030_v24 = vpop.f32.mrb[89].mxu1  ;;  %v2039_v36 = vadd.f32 %v2827_v44, %v1926_v5 }
 0x5c4   : > { %v2828_v22 = vpop.f32.mrb[90].mxu1  ;;  %v2031_v53 = vadd.f32 %v2030_v24, %v1926_v5 }
 0x5c5   : > { %v2042_v26 = vadd.f32 %v2828_v22, %v1926_v5  ;;  %v2033_v47 = vpop.f32.mrb[91].mxu1 }
 0x5c6   : > { %v2034_v29 = vadd.f32 %v2033_v47, %v1926_v5 }
 0x5c7   : > { %v2397_v27 = vpack.c.bf16 %v2042_v26, %v2039_v36 }
 0x5c8   : > { %v2392_v30 = vpack.c.bf16 %v2034_v29, %v2031_v53 }
 0x5c9   : > { %2413 = vst [vmem:[%s3557_s26 + $0x28] sm:$0xff] %v2397_v27  }
 0x5ca   : > { %2412 = vst [vmem:[%s3557_s26 + $0x20] sm:$0xff] %v2392_v30  }
 0x5d2   : > { %v2831_v56 = vpop.f32.mrb[92].mxu1 }
 0x5d3   : > { %v2046_v31 = vpop.f32.mrb[93].mxu1  ;;  %v2055_v33 = vadd.f32 %v2831_v56, %v1926_v5 }
 0x5d4   : > { %v2832_v32 = vpop.f32.mrb[94].mxu1  ;;  %v2047_v62 = vadd.f32 %v2046_v31, %v1926_v5 }
 0x5d5   : > { %v2058_v37 = vadd.f32 %v2832_v32, %v1926_v5  ;;  %v2049_v39 = vpop.f32.mrb[95].mxu1 }
 0x5d6   : > { %v2050_v41 = vadd.f32 %v2049_v39, %v1926_v5 }
 0x5d7   : > { %v2407_v42 = vpack.c.bf16 %v2058_v37, %v2055_v33 }
 0x5d8   : > { %v2402_v43 = vpack.c.bf16 %v2050_v41, %v2047_v62 }
 0x5d9   : > { %2415 = vst [vmem:[%s3557_s26 + $0x38] sm:$0xff] %v2407_v42  }
 0x5da   : > { %2414 = vst [vmem:[%s3557_s26 + $0x30] sm:$0xff] %v2402_v43  }
 0x5db   : > { %2964 = shalt.err (!%p2961_p3)
}
 0x5dc   : > { %s2965_s9 = scalar_lea.hbm %s3570_s30, 1024  ;;  %s2969_s17 = scalar_lea.hbm %s3622_s3, 2048 }
 0x5dd   : > { %p2966_p4 = scmp.ne.s32.totalorder %s3570_s30, %s2965_s9  ;;  %p2970_p9 = scmp.lt.u32.totalorder %s3570_s30, %s3622_s3 }
 0x5de   : > { %p2971_p10 = scmp.lt.u32.totalorder %s2969_s17, %s2965_s9  ;;  %p2973_p12 = scmp.lt.u32.totalorder %s2965_s9, %s3570_s30 }
 0x5df   : > { %p2967_p7 = pnand %p2966_p4, %p3076_p5 }
 0x5e0   : > { %p2972_p11 = por %p2971_p10, %p2970_p9 }
 0x5e1   : > { %p2968_p8 = pneg %p2967_p7 }
 0x5e2   : > { %p2974_p13 = por %p2973_p12, %p2972_p11 }
 0x5e4   : > { %p2975_p0 = pnand %p2974_p13, %p2968_p8 }
 0x5e6   : > { %2978 = shalt.err (!%p2975_p0)
}
 0x5e7   : > { %s3016_s24 = smov 64   ;;  %s3017_s25 = smov 4  }
 0x5e8   : > { %2834 = dma.vmem_to_hbm [thread:$0]  (%p3076_p5), %s3572_s5, 1024, %s3570_s30, %s3578_s16, %s3016_s24, %s3016_s24, %s3017_s25  }
 0x5e9 PF: > { %p2840_p1 = scmp.ge.s32.totalorder %s3013_s15, 2  ;;  %s2170_s26 = sand.u32 1, %s3001_s12  }
 0x5ea   : > { %s2171_s27 = scalar_lea.sflag [#allocation3], %s2170_s26 }
 0x5eb   : > { %p2837_p2 = pnand %p2840_p1, %p3080_p6 }
 0x5ed   : > { %2996 = dma.done.wait (!%p2837_p2), %s2171_s27, 1024  }
 0x5ee   : > { %2998 = vsyncadd (!%p2837_p2), %s2171_s27, 4294966272  ;;  %p13_p3 = scmp.ge.s32.totalorder %s3063_s18, 4   ;;  %s3625_s12 = smov %s3005_s13 }
 0x5ef   : > { %s3626_s13 = smov %s3009_s14  ;;  %s3627_s14 = smov %s3074_s21 }
 0x5f0   : > { %s3628_s15 = smov %s3063_s18  ;;  %15 = sbr.rel (!%p13_p3) target bundleno = 3 (0x3), region = 67 }
 0x5f7   :  { %2176 = vsyncpa [#allocation3], 1 }
 0x5f8   :  { %2178 = vsyncpa [#allocation3 + $0x1], 1 }

</bundles_post_ra>
